<compile_context>
chip_gen: v5e
topology: v5e:2x2
jax: 0.10.0
libtpu: 0.0.40
codegen_flags: <defaults>
</compile_context>

<pallas_src>
import jax
import jax.numpy as jnp
from jax.experimental import pallas as pl
from jax.experimental.pallas import tpu as pltpu


VMEM_LIMIT_BYTES = 48 * 1024 * 1024      # explicit scoped-VMEM limit (< v7x 64 MiB)
MATMUL_VMEM_BUDGET = 36 * 1024 * 1024    # double-buffered tile budget for the search


# ---------------------------------------------------------------------------
# Helpers
# ---------------------------------------------------------------------------

def _round_up(x, m):
    return (x + m - 1) // m * m


def _divisor_tiles(dim, cap, unit=128):
    """Multiples of `unit` that divide `dim` and are <= cap, descending."""
    ts = [t for t in range(unit, min(dim, cap) + 1, unit) if dim % t == 0]
    return sorted(ts, reverse=True) if ts else [unit]


def _largest_tile(dim, cap, unit=128):
    return _divisor_tiles(dim, cap, unit)[0]


def _matmul_vmem_bytes(tm, tn, tk):
    a = tm * tk * 2                  # bf16 A block
    b = tk * tn * 2                  # bf16 B block (weights)
    y = tm * tn * 4                  # f32 output block
    stats = 2 * 8 * tn * 4           # psum + psq blocks
    return 2 * (a + b + y + stats)   # everything conservatively double-buffered


def _pick_matmul_tiles(MP, K, N, budget=MATMUL_VMEM_BUDGET):
    """Priority (per perf review): deepest K tile (ideally full K, so the
    weight stays VMEM-resident and there is no RMW accumulate), then widest N
    tile, then tallest M tile (<= 512), all within the VMEM budget."""
    for tk in _divisor_tiles(K, K):
        for tn in _divisor_tiles(N, N):
            for tm in _divisor_tiles(MP, 512):
                if _matmul_vmem_bytes(tm, tn, tk) <= budget:
                    # v7x megacore: keep >= 2 blocks on a parallel axis if we can.
                    if MP // tm == 1 and N // tn == 1 and MP >= 256:
                        tm = _largest_tile(MP, MP // 2)
                    return tm, tn, tk
    return 128, 128, 128


# ---------------------------------------------------------------------------
# Pallas kernels
# ---------------------------------------------------------------------------

def _matmul_stats_kernel(a_ref, b_ref, y_ref, psum_ref, psq_ref):
    """bf16 @ bf16 -> f32 block, accumulated directly into y_ref across k
    (direct store on k==0, '+=' only for k>0).  On the last k step, emit
    per-sublane partial column sums / sums-of-squares, reading y back in
    8-row ref slices to keep vector-register pressure low."""
    k = pl.program_id(2)
    part = jnp.dot(a_ref[...], b_ref[...], preferred_element_type=jnp.float32)

    @pl.when(k == 0)
    def _():
        y_ref[...] = part

    @pl.when(k > 0)
    def _():
        y_ref[...] += part

    @pl.when(k == pl.num_programs(2) - 1)
    def _():
        tm = y_ref.shape[0]
        s = jnp.zeros(psum_ref.shape, jnp.float32)
        q = jnp.zeros(psq_ref.shape, jnp.float32)
        # Per-sublane partials via 8-row ref loads: pure VPU adds that hide in
        # spare slots; the cross-sublane reduction is a tiny JAX reduce outside.
        for g in range(tm // 8):
            yg = y_ref[g * 8:(g + 1) * 8, :]
            s = s + yg
            q = q + yg * yg
        psum_ref[...] = s
        psq_ref[...] = q


def pallas_matmul_stats(a, b, *, tm, tn, tk):
    """C = A @ B (f32) plus per-row-tile partial column sums / sums-of-squares.

    A: (M, K) bf16, B: (K, N) bf16.  Returns (y (M,N) f32,
    psum (M//tm*8, N) f32, psq (M//tm*8, N) f32).
    """
    M, K = a.shape
    K2, N = b.shape
    assert K == K2 and M % tm == 0 and N % tn == 0 and K % tk == 0
    mt = M // tm
    return pl.pallas_call(
        _matmul_stats_kernel,
        out_shape=(
            jax.ShapeDtypeStruct((M, N), jnp.float32),
            jax.ShapeDtypeStruct((mt * 8, N), jnp.float32),
            jax.ShapeDtypeStruct((mt * 8, N), jnp.float32),
        ),
        grid_spec=pltpu.PrefetchScalarGridSpec(
            num_scalar_prefetch=0,
            grid=(mt, N // tn, K // tk),
            in_specs=[
                pl.BlockSpec((tm, tk), lambda i, j, k: (i, k)),
                # With tn == N and tk == K this block index is constant, so the
                # weights are fetched into VMEM once and stay resident.
                pl.BlockSpec((tk, tn), lambda i, j, k: (k, j)),
            ],
            out_specs=[
                pl.BlockSpec((tm, tn), lambda i, j, k: (i, j)),
                pl.BlockSpec((8, tn), lambda i, j, k: (i, j)),
                pl.BlockSpec((8, tn), lambda i, j, k: (i, j)),
            ],
        ),
        compiler_params=pltpu.CompilerParams(
            dimension_semantics=("parallel", "parallel", "arbitrary"),
            vmem_limit_bytes=VMEM_LIMIT_BYTES),
    )(a, b)


def _bn_relu_kernel(y_ref, scale_ref, shift_ref, o_ref):
    o_ref[...] = jnp.maximum(
        y_ref[...] * scale_ref[...] + shift_ref[...], 0.0).astype(o_ref.dtype)


def pallas_bn_relu(y, scale, shift, *, tm, tc, out_dtype):
    """Fused y*scale + shift -> ReLU, per-column scale/shift ((1, C) each).
    When the output dtype matches y, the output buffer aliases y."""
    M, C = y.shape
    assert M % tm == 0 and C % tc == 0
    alias = {0: 0} if out_dtype == y.dtype else {}
    return pl.pallas_call(
        _bn_relu_kernel,
        out_shape=jax.ShapeDtypeStruct((M, C), out_dtype),
        grid_spec=pltpu.PrefetchScalarGridSpec(
            num_scalar_prefetch=0,
            grid=(M // tm, C // tc),
            in_specs=[pl.BlockSpec((tm, tc), lambda i, j: (i, j)),
                      pl.BlockSpec((1, tc), lambda i, j: (0, j)),
                      pl.BlockSpec((1, tc), lambda i, j: (0, j))],
            out_specs=pl.BlockSpec((tm, tc), lambda i, j: (i, j)),
        ),
        compiler_params=pltpu.CompilerParams(
            dimension_semantics=("parallel", "parallel"),
            vmem_limit_bytes=VMEM_LIMIT_BYTES),
        input_output_aliases=alias,
    )(y, scale, shift)


# ---------------------------------------------------------------------------
# JAX glue: im2col + per-layer wrapper
# ---------------------------------------------------------------------------

def im2col(x_nhwc, ksize=3, stride=1, pad=1):
    N, H, W, C = x_nhwc.shape
    xp = jnp.pad(x_nhwc, ((0, 0), (pad, pad), (pad, pad), (0, 0)))
    Ho = (H + 2 * pad - ksize) // stride + 1
    Wo = (W + 2 * pad - ksize) // stride + 1
    taps = []
    for kh in range(ksize):
        for kw in range(ksize):
            taps.append(xp[:, kh:kh + stride * Ho:stride,
                           kw:kw + stride * Wo:stride, :])
    p = jnp.stack(taps, axis=3)                      # (N, Ho, Wo, 9, C)
    return p.reshape(N * Ho * Wo, ksize * ksize * C), Ho, Wo


def conv_bn_relu(x_nhwc, w_oihw, gamma, beta, *, stride, out_dtype,
                 eps=1e-5):
    """Conv2d(3x3, pad=1, no bias) -> BatchNorm2d(train mode) -> ReLU."""
    N, H, W, Cin = x_nhwc.shape
    Cout = w_oihw.shape[0]
    assert Cin % 128 == 0 and Cout % 128 == 0, \
        "channel counts must be multiples of 128 for this kernel"

    # bf16 operands for the MXU (f32 accumulation inside the kernel).
    patches, Ho, Wo = im2col(x_nhwc.astype(jnp.bfloat16), 3, stride, 1)
    M, K = patches.shape
    w_mat = jnp.transpose(w_oihw, (2, 3, 1, 0)).reshape(K, Cout)
    w_mat = w_mat.astype(jnp.bfloat16)

    # Pad M to a multiple of 128 (zero rows -> zero conv outputs, which add
    # nothing to the BN sums; the true M is used as the denominator).
    MP = _round_up(M, 128)
    if MP != M:
        patches = jnp.pad(patches, ((0, MP - M), (0, 0)))

    tm, tn, tk = _pick_matmul_tiles(MP, K, Cout)

    y, psum, psq = pallas_matmul_stats(patches, w_mat, tm=tm, tn=tn, tk=tk)

    # Finalize BN batch statistics (tiny reduce over M//tm * 8 partial rows).
    # NOTE: single-pass E[y^2]-E[y]^2 in f32 — adequate at these sizes; for
    # very large M a shifted / two-pass formulation would be preferable.
    sums = jnp.sum(psum, axis=0)
    sqs = jnp.sum(psq, axis=0)
    mean = sums / M
    var = jnp.maximum(sqs / M - mean * mean, 0.0)    # biased var (PyTorch BN)
    scale = gamma * jax.lax.rsqrt(var + eps)
    shift = beta - mean * scale

    tmb = _largest_tile(MP, 512)
    tcb = _largest_tile(Cout, 1024)
    out = pallas_bn_relu(y, scale[None, :], shift[None, :],
                         tm=tmb, tc=tcb, out_dtype=out_dtype)
    out = out[:M]
    return out.reshape(N, Ho, Wo, Cout)


def student_s64_forward(x_nchw, params):
    """Full StudentS64 forward. Input/output are NCHW (PyTorch convention)."""
    x = jnp.transpose(x_nchw, (0, 2, 3, 1))                   # NCHW -> NHWC
    x = conv_bn_relu(x, params["w1"], params["g1"], params["b1"],
                     stride=2, out_dtype=jnp.bfloat16)        # bf16 activations
    x = conv_bn_relu(x, params["w2"], params["g2"], params["b2"],
                     stride=1, out_dtype=jnp.float32)         # final in f32
    return jnp.transpose(x, (0, 3, 1, 2))                     # NHWC -> NCHW


# ---------------------------------------------------------------------------
# Pure-JAX reference (same math, same bf16 operand rounding, no Pallas)
# ---------------------------------------------------------------------------

def _ref_forward(x_nchw, params):
    def conv(x, w, stride):
        return jax.lax.conv_general_dilated(
            x.astype(jnp.bfloat16), w.astype(jnp.bfloat16),
            (stride, stride), ((1, 1), (1, 1)),
            dimension_numbers=("NCHW", "OIHW", "NCHW"),
            preferred_element_type=jnp.float32)

    def bn_relu(y, g, b):
        mean = jnp.mean(y, axis=(0, 2, 3), keepdims=True)
        var = jnp.mean((y - mean) ** 2, axis=(0, 2, 3), keepdims=True)
        yh = (y - mean) * jax.lax.rsqrt(var + 1e-5)
        yh = yh * g[None, :, None, None] + b[None, :, None, None]
        return jnp.maximum(yh, 0.0)

    y = bn_relu(conv(x_nchw, params["w1"], 2), params["g1"], params["b1"])
    return bn_relu(conv(y, params["w2"], 1), params["g2"], params["b2"])


# ---------------------------------------------------------------------------
# Main
# ---------------------------------------------------------------------------

if __name__ == "__main__":
    # Small, TPU-friendly shapes consistent with the module structure
    # (module defaults are in=512, out=1024; scaled down to 128/128 here).
    N, Cin, Cout, H, W = 2, 128, 128, 16, 16

    key = jax.random.PRNGKey(0)
    k_x, k_w1, k_w2, k_g1, k_b1, k_g2, k_b2 = jax.random.split(key, 7)

    x = jax.random.normal(k_x, (N, Cin, H, W), dtype=jnp.float32)

    fan_in1 = 9 * Cin
    fan_in2 = 9 * Cout
    params = {
        "w1": jax.random.normal(k_w1, (Cout, Cin, 3, 3), jnp.float32)
              * (2.0 / fan_in1) ** 0.5,
        "g1": 1.0 + 0.1 * jax.random.normal(k_g1, (Cout,), jnp.float32),
        "b1": 0.1 * jax.random.normal(k_b1, (Cout,), jnp.float32),
        "w2": jax.random.normal(k_w2, (Cout, Cout, 3, 3), jnp.float32)
              * (2.0 / fan_in2) ** 0.5,
        "g2": 1.0 + 0.1 * jax.random.normal(k_g2, (Cout,), jnp.float32),
        "b2": 0.1 * jax.random.normal(k_b2, (Cout,), jnp.float32),
    }

    out = jax.jit(student_s64_forward)(x, params)
    out = jax.block_until_ready(out)

    ref = jax.block_until_ready(_ref_forward(x, params))

    assert out.shape == (N, Cout, H // 2, W // 2), out.shape
    max_err = float(jnp.max(jnp.abs(out - ref)))
    assert jnp.allclose(out, ref, rtol=5e-3, atol=5e-3), max_err

    print("KERNEL_OK")
</pallas_src>

<mosaic_0001>
module attributes {stable_mosaic.version = 11 : i64} {
  func.func @_matmul_stats_kernel(%arg0: i32, %arg1: i32, %arg2: i32, %arg3: memref<128x1152xbf16, #tpu.memory_space<vmem>>, %arg4: memref<1152x128xbf16, #tpu.memory_space<vmem>>, %arg5: memref<128x128xf32, #tpu.memory_space<vmem>>, %arg6: memref<8x128xf32, #tpu.memory_space<vmem>>, %arg7: memref<8x128xf32, #tpu.memory_space<vmem>>) attributes {dimension_semantics = [#tpu.dimension_semantics<parallel>, #tpu.dimension_semantics<parallel>, #tpu.dimension_semantics<arbitrary>], iteration_bounds = array<i64: 1, 1, 1>, scalar_prefetch = 0 : i64, scratch_operands = 0 : i64, tpu.core_type = #tpu.core_type<tc>, window_params = [{transform_indices = @transform_0, window_bounds = array<i64: 128, 1152>}, {transform_indices = @transform_1, window_bounds = array<i64: 1152, 128>}, {transform_indices = @transform_2, window_bounds = array<i64: 128, 128>}, {transform_indices = @transform_3, window_bounds = array<i64: 8, 128>}, {transform_indices = @transform_4, window_bounds = array<i64: 8, 128>}]} {
    %c0 = arith.constant 0 : index
    %c0_0 = arith.constant 0 : index
    %0 = vector.load %arg3[%c0, %c0_0] : memref<128x1152xbf16, #tpu.memory_space<vmem>>, vector<128x1152xbf16>
    %c0_1 = arith.constant 0 : index
    %c0_2 = arith.constant 0 : index
    %1 = vector.load %arg4[%c0_1, %c0_2] : memref<1152x128xbf16, #tpu.memory_space<vmem>>, vector<1152x128xbf16>
    %cst = arith.constant dense<0.000000e+00> : vector<128x128xf32>
    %2 = tpu.matmul %0, %1, %cst {dimension_numbers = #tpu.dot_dimension_numbers<[1], [0], [0], [1], [0, 0, 1, 1], [], []>} : vector<128x1152xbf16>, vector<1152x128xbf16>, vector<128x128xf32> -> vector<128x128xf32>
    %c0_i32 = arith.constant 0 : i32
    %3 = arith.cmpi eq, %arg2, %c0_i32 : i32
    %4 = arith.extui %3 : i1 to i32
    %c0_i32_3 = arith.constant 0 : i32
    %5 = arith.cmpi ne, %4, %c0_i32_3 : i32
    scf.if %5 {
      %c0_8 = arith.constant 0 : index
      %c0_9 = arith.constant 0 : index
      %12 = vector.load %arg5[%c0_8, %c0_9] : memref<128x128xf32, #tpu.memory_space<vmem>>, vector<128x128xf32>
      tpu.vector_store %arg5[%c0_8, %c0_9], %2 {strides = array<i32>} : memref<128x128xf32, #tpu.memory_space<vmem>>, vector<128x128xf32>,
    } else {
    }
    %c0_i32_4 = arith.constant 0 : i32
    %6 = arith.cmpi sgt, %arg2, %c0_i32_4 : i32
    %7 = arith.extui %6 : i1 to i32
    %c0_i32_5 = arith.constant 0 : i32
    %8 = arith.cmpi ne, %7, %c0_i32_5 : i32
    scf.if %8 {
      %c0_8 = arith.constant 0 : index
      %c0_9 = arith.constant 0 : index
      %12 = vector.load %arg5[%c0_8, %c0_9] : memref<128x128xf32, #tpu.memory_space<vmem>>, vector<128x128xf32>
      %13 = arith.addf %12, %2 : vector<128x128xf32>
      %c0_10 = arith.constant 0 : index
      %c0_11 = arith.constant 0 : index
      %14 = vector.load %arg5[%c0_10, %c0_11] : memref<128x128xf32, #tpu.memory_space<vmem>>, vector<128x128xf32>
      tpu.vector_store %arg5[%c0_10, %c0_11], %13 {strides = array<i32>} : memref<128x128xf32, #tpu.memory_space<vmem>>, vector<128x128xf32>,
    } else {
    }
    %c0_i32_6 = arith.constant 0 : i32
    %9 = arith.cmpi eq, %arg2, %c0_i32_6 : i32
    %10 = arith.extui %9 : i1 to i32
    %c0_i32_7 = arith.constant 0 : i32
    %11 = arith.cmpi ne, %10, %c0_i32_7 : i32
    scf.if %11 {
      %cst_8 = arith.constant 0.000000e+00 : f32
      %12 = vector.broadcast %cst_8 : f32 to vector<8x128xf32>
      %cst_9 = arith.constant 0.000000e+00 : f32
      %13 = vector.broadcast %cst_9 : f32 to vector<8x128xf32>
      %c0_10 = arith.constant 0 : index
      %c0_11 = arith.constant 0 : index
      %14 = vector.load %arg5[%c0_10, %c0_11] : memref<128x128xf32, #tpu.memory_space<vmem>>, vector<8x128xf32>
      %15 = arith.addf %12, %14 : vector<8x128xf32>
      %16 = arith.mulf %14, %14 : vector<8x128xf32>
      %17 = arith.addf %13, %16 : vector<8x128xf32>
      %c8 = arith.constant 8 : index
      %c0_12 = arith.constant 0 : index
      %18 = vector.load %arg5[%c8, %c0_12] : memref<128x128xf32, #tpu.memory_space<vmem>>, vector<8x128xf32>
      %19 = arith.addf %15, %18 : vector<8x128xf32>
      %20 = arith.mulf %18, %18 : vector<8x128xf32>
      %21 = arith.addf %17, %20 : vector<8x128xf32>
      %c16 = arith.constant 16 : index
      %c0_13 = arith.constant 0 : index
      %22 = vector.load %arg5[%c16, %c0_13] : memref<128x128xf32, #tpu.memory_space<vmem>>, vector<8x128xf32>
      %23 = arith.addf %19, %22 : vector<8x128xf32>
      %24 = arith.mulf %22, %22 : vector<8x128xf32>
      %25 = arith.addf %21, %24 : vector<8x128xf32>
      %c24 = arith.constant 24 : index
      %c0_14 = arith.constant 0 : index
      %26 = vector.load %arg5[%c24, %c0_14] : memref<128x128xf32, #tpu.memory_space<vmem>>, vector<8x128xf32>
      %27 = arith.addf %23, %26 : vector<8x128xf32>
      %28 = arith.mulf %26, %26 : vector<8x128xf32>
      %29 = arith.addf %25, %28 : vector<8x128xf32>
      %c32 = arith.constant 32 : index
      %c0_15 = arith.constant 0 : index
      %30 = vector.load %arg5[%c32, %c0_15] : memref<128x128xf32, #tpu.memory_space<vmem>>, vector<8x128xf32>
      %31 = arith.addf %27, %30 : vector<8x128xf32>
      %32 = arith.mulf %30, %30 : vector<8x128xf32>
      %33 = arith.addf %29, %32 : vector<8x128xf32>
      %c40 = arith.constant 40 : index
      %c0_16 = arith.constant 0 : index
      %34 = vector.load %arg5[%c40, %c0_16] : memref<128x128xf32, #tpu.memory_space<vmem>>, vector<8x128xf32>
      %35 = arith.addf %31, %34 : vector<8x128xf32>
      %36 = arith.mulf %34, %34 : vector<8x128xf32>
      %37 = arith.addf %33, %36 : vector<8x128xf32>
      %c48 = arith.constant 48 : index
      %c0_17 = arith.constant 0 : index
      %38 = vector.load %arg5[%c48, %c0_17] : memref<128x128xf32, #tpu.memory_space<vmem>>, vector<8x128xf32>
      %39 = arith.addf %35, %38 : vector<8x128xf32>
      %40 = arith.mulf %38, %38 : vector<8x128xf32>
      %41 = arith.addf %37, %40 : vector<8x128xf32>
      %c56 = arith.constant 56 : index
      %c0_18 = arith.constant 0 : index
      %42 = vector.load %arg5[%c56, %c0_18] : memref<128x128xf32, #tpu.memory_space<vmem>>, vector<8x128xf32>
      %43 = arith.addf %39, %42 : vector<8x128xf32>
      %44 = arith.mulf %42, %42 : vector<8x128xf32>
      %45 = arith.addf %41, %44 : vector<8x128xf32>
      %c64 = arith.constant 64 : index
      %c0_19 = arith.constant 0 : index
      %46 = vector.load %arg5[%c64, %c0_19] : memref<128x128xf32, #tpu.memory_space<vmem>>, vector<8x128xf32>
      %47 = arith.addf %43, %46 : vector<8x128xf32>
      %48 = arith.mulf %46, %46 : vector<8x128xf32>
      %49 = arith.addf %45, %48 : vector<8x128xf32>
      %c72 = arith.constant 72 : index
      %c0_20 = arith.constant 0 : index
      %50 = vector.load %arg5[%c72, %c0_20] : memref<128x128xf32, #tpu.memory_space<vmem>>, vector<8x128xf32>
      %51 = arith.addf %47, %50 : vector<8x128xf32>
      %52 = arith.mulf %50, %50 : vector<8x128xf32>
      %53 = arith.addf %49, %52 : vector<8x128xf32>
      %c80 = arith.constant 80 : index
      %c0_21 = arith.constant 0 : index
      %54 = vector.load %arg5[%c80, %c0_21] : memref<128x128xf32, #tpu.memory_space<vmem>>, vector<8x128xf32>
      %55 = arith.addf %51, %54 : vector<8x128xf32>
      %56 = arith.mulf %54, %54 : vector<8x128xf32>
      %57 = arith.addf %53, %56 : vector<8x128xf32>
      %c88 = arith.constant 88 : index
      %c0_22 = arith.constant 0 : index
      %58 = vector.load %arg5[%c88, %c0_22] : memref<128x128xf32, #tpu.memory_space<vmem>>, vector<8x128xf32>
      %59 = arith.addf %55, %58 : vector<8x128xf32>
      %60 = arith.mulf %58, %58 : vector<8x128xf32>
      %61 = arith.addf %57, %60 : vector<8x128xf32>
      %c96 = arith.constant 96 : index
      %c0_23 = arith.constant 0 : index
      %62 = vector.load %arg5[%c96, %c0_23] : memref<128x128xf32, #tpu.memory_space<vmem>>, vector<8x128xf32>
      %63 = arith.addf %59, %62 : vector<8x128xf32>
      %64 = arith.mulf %62, %62 : vector<8x128xf32>
      %65 = arith.addf %61, %64 : vector<8x128xf32>
      %c104 = arith.constant 104 : index
      %c0_24 = arith.constant 0 : index
      %66 = vector.load %arg5[%c104, %c0_24] : memref<128x128xf32, #tpu.memory_space<vmem>>, vector<8x128xf32>
      %67 = arith.addf %63, %66 : vector<8x128xf32>
      %68 = arith.mulf %66, %66 : vector<8x128xf32>
      %69 = arith.addf %65, %68 : vector<8x128xf32>
      %c112 = arith.constant 112 : index
      %c0_25 = arith.constant 0 : index
      %70 = vector.load %arg5[%c112, %c0_25] : memref<128x128xf32, #tpu.memory_space<vmem>>, vector<8x128xf32>
      %71 = arith.addf %67, %70 : vector<8x128xf32>
      %72 = arith.mulf %70, %70 : vector<8x128xf32>
      %73 = arith.addf %69, %72 : vector<8x128xf32>
      %c120 = arith.constant 120 : index
      %c0_26 = arith.constant 0 : index
      %74 = vector.load %arg5[%c120, %c0_26] : memref<128x128xf32, #tpu.memory_space<vmem>>, vector<8x128xf32>
      %75 = arith.addf %71, %74 : vector<8x128xf32>
      %76 = arith.mulf %74, %74 : vector<8x128xf32>
      %77 = arith.addf %73, %76 : vector<8x128xf32>
      %c0_27 = arith.constant 0 : index
      %c0_28 = arith.constant 0 : index
      %78 = vector.load %arg6[%c0_27, %c0_28] : memref<8x128xf32, #tpu.memory_space<vmem>>, vector<8x128xf32>
      tpu.vector_store %arg6[%c0_27, %c0_28], %75 {strides = array<i32>} : memref<8x128xf32, #tpu.memory_space<vmem>>, vector<8x128xf32>,
      %c0_29 = arith.constant 0 : index
      %c0_30 = arith.constant 0 : index
      %79 = vector.load %arg7[%c0_29, %c0_30] : memref<8x128xf32, #tpu.memory_space<vmem>>, vector<8x128xf32>
      tpu.vector_store %arg7[%c0_29, %c0_30], %77 {strides = array<i32>} : memref<8x128xf32, #tpu.memory_space<vmem>>, vector<8x128xf32>,
    } else {
    }
    return
  }
  func.func @transform_0(%arg0: i32, %arg1: i32, %arg2: i32) -> (i32, i32) {
    %c0_i32 = arith.constant 0 : i32
    return %arg0, %arg2 : i32, i32
  }
  func.func @transform_1(%arg0: i32, %arg1: i32, %arg2: i32) -> (i32, i32) {
    %c0_i32 = arith.constant 0 : i32
    return %arg2, %arg1 : i32, i32
  }
  func.func @transform_2(%arg0: i32, %arg1: i32, %arg2: i32) -> (i32, i32) {
    %c0_i32 = arith.constant 0 : i32
    return %arg0, %arg1 : i32, i32
  }
  func.func @transform_3(%arg0: i32, %arg1: i32, %arg2: i32) -> (i32, i32) {
    %c0_i32 = arith.constant 0 : i32
    return %arg0, %arg1 : i32, i32
  }
  func.func @transform_4(%arg0: i32, %arg1: i32, %arg2: i32) -> (i32, i32) {
    %c0_i32 = arith.constant 0 : i32
    return %arg0, %arg1 : i32, i32
  }
}

module attributes {stable_mosaic.version = 11 : i64} {
  func.func @_bn_relu_kernel(%arg0: i32, %arg1: i32, %arg2: memref<128x128xf32, #tpu.memory_space<vmem>>, %arg3: memref<1x128xf32, #tpu.memory_space<vmem>>, %arg4: memref<1x128xf32, #tpu.memory_space<vmem>>, %arg5: memref<128x128xbf16, #tpu.memory_space<vmem>>) attributes {dimension_semantics = [#tpu.dimension_semantics<parallel>, #tpu.dimension_semantics<parallel>], iteration_bounds = array<i64: 1, 1>, scalar_prefetch = 0 : i64, scratch_operands = 0 : i64, tpu.core_type = #tpu.core_type<tc>, window_params = [{transform_indices = @transform_0, window_bounds = array<i64: 128, 128>}, {transform_indices = @transform_1, window_bounds = array<i64: 1, 128>}, {transform_indices = @transform_2, window_bounds = array<i64: 1, 128>}, {transform_indices = @transform_3, window_bounds = array<i64: 128, 128>}]} {
    %c0 = arith.constant 0 : index
    %c0_0 = arith.constant 0 : index
    %0 = vector.load %arg2[%c0, %c0_0] : memref<128x128xf32, #tpu.memory_space<vmem>>, vector<128x128xf32>
    %c0_1 = arith.constant 0 : index
    %c0_2 = arith.constant 0 : index
    %1 = vector.load %arg3[%c0_1, %c0_2] : memref<1x128xf32, #tpu.memory_space<vmem>>, vector<1x128xf32>
    %2 = vector.broadcast %1 : vector<1x128xf32> to vector<128x128xf32>
    %3 = arith.mulf %0, %2 : vector<128x128xf32>
    %c0_3 = arith.constant 0 : index
    %c0_4 = arith.constant 0 : index
    %4 = vector.load %arg4[%c0_3, %c0_4] : memref<1x128xf32, #tpu.memory_space<vmem>>, vector<1x128xf32>
    %5 = vector.broadcast %4 : vector<1x128xf32> to vector<128x128xf32>
    %6 = arith.addf %3, %5 : vector<128x128xf32>
    %cst = arith.constant 0.000000e+00 : f32
    %7 = vector.broadcast %cst : f32 to vector<128x128xf32>
    %8 = arith.maximumf %6, %7 : vector<128x128xf32>
    %9 = arith.truncf %8 : vector<128x128xf32> to vector<128x128xbf16>
    %c0_5 = arith.constant 0 : index
    %c0_6 = arith.constant 0 : index
    %10 = vector.load %arg5[%c0_5, %c0_6] : memref<128x128xbf16, #tpu.memory_space<vmem>>, vector<128x128xbf16>
    tpu.vector_store %arg5[%c0_5, %c0_6], %9 {strides = array<i32>} : memref<128x128xbf16, #tpu.memory_space<vmem>>, vector<128x128xbf16>,
    return
  }
  func.func @transform_0(%arg0: i32, %arg1: i32) -> (i32, i32) {
    %c0_i32 = arith.constant 0 : i32
    return %arg0, %arg1 : i32, i32
  }
  func.func @transform_1(%arg0: i32, %arg1: i32) -> (i32, i32) {
    %c0_i32 = arith.constant 0 : i32
    %c0_i32_0 = arith.constant 0 : i32
    return %c0_i32, %arg1 : i32, i32
  }
  func.func @transform_2(%arg0: i32, %arg1: i32) -> (i32, i32) {
    %c0_i32 = arith.constant 0 : i32
    %c0_i32_0 = arith.constant 0 : i32
    return %c0_i32, %arg1 : i32, i32
  }
  func.func @transform_3(%arg0: i32, %arg1: i32) -> (i32, i32) {
    %c0_i32 = arith.constant 0 : i32
    return %arg0, %arg1 : i32, i32
  }
}

module attributes {stable_mosaic.version = 11 : i64} {
  func.func @_bn_relu_kernel(%arg0: i32, %arg1: i32, %arg2: memref<128x128xf32, #tpu.memory_space<vmem>>, %arg3: memref<1x128xf32, #tpu.memory_space<vmem>>, %arg4: memref<1x128xf32, #tpu.memory_space<vmem>>, %arg5: memref<128x128xf32, #tpu.memory_space<vmem>>) attributes {dimension_semantics = [#tpu.dimension_semantics<parallel>, #tpu.dimension_semantics<parallel>], iteration_bounds = array<i64: 1, 1>, scalar_prefetch = 0 : i64, scratch_operands = 0 : i64, tpu.core_type = #tpu.core_type<tc>, window_params = [{transform_indices = @transform_0, window_bounds = array<i64: 128, 128>}, {transform_indices = @transform_1, window_bounds = array<i64: 1, 128>}, {transform_indices = @transform_2, window_bounds = array<i64: 1, 128>}, {transform_indices = @transform_3, window_bounds = array<i64: 128, 128>}]} {
    %c0 = arith.constant 0 : index
    %c0_0 = arith.constant 0 : index
    %0 = vector.load %arg2[%c0, %c0_0] : memref<128x128xf32, #tpu.memory_space<vmem>>, vector<128x128xf32>
    %c0_1 = arith.constant 0 : index
    %c0_2 = arith.constant 0 : index
    %1 = vector.load %arg3[%c0_1, %c0_2] : memref<1x128xf32, #tpu.memory_space<vmem>>, vector<1x128xf32>
    %2 = vector.broadcast %1 : vector<1x128xf32> to vector<128x128xf32>
    %3 = arith.mulf %0, %2 : vector<128x128xf32>
    %c0_3 = arith.constant 0 : index
    %c0_4 = arith.constant 0 : index
    %4 = vector.load %arg4[%c0_3, %c0_4] : memref<1x128xf32, #tpu.memory_space<vmem>>, vector<1x128xf32>
    %5 = vector.broadcast %4 : vector<1x128xf32> to vector<128x128xf32>
    %6 = arith.addf %3, %5 : vector<128x128xf32>
    %cst = arith.constant 0.000000e+00 : f32
    %7 = vector.broadcast %cst : f32 to vector<128x128xf32>
    %8 = arith.maximumf %6, %7 : vector<128x128xf32>
    %c0_5 = arith.constant 0 : index
    %c0_6 = arith.constant 0 : index
    %9 = vector.load %arg5[%c0_5, %c0_6] : memref<128x128xf32, #tpu.memory_space<vmem>>, vector<128x128xf32>
    tpu.vector_store %arg5[%c0_5, %c0_6], %8 {strides = array<i32>} : memref<128x128xf32, #tpu.memory_space<vmem>>, vector<128x128xf32>,
    return
  }
  func.func @transform_0(%arg0: i32, %arg1: i32) -> (i32, i32) {
    %c0_i32 = arith.constant 0 : i32
    return %arg0, %arg1 : i32, i32
  }
  func.func @transform_1(%arg0: i32, %arg1: i32) -> (i32, i32) {
    %c0_i32 = arith.constant 0 : i32
    %c0_i32_0 = arith.constant 0 : i32
    return %c0_i32, %arg1 : i32, i32
  }
  func.func @transform_2(%arg0: i32, %arg1: i32) -> (i32, i32) {
    %c0_i32 = arith.constant 0 : i32
    %c0_i32_0 = arith.constant 0 : i32
    return %c0_i32, %arg1 : i32, i32
  }
  func.func @transform_3(%arg0: i32, %arg1: i32) -> (i32, i32) {
    %c0_i32 = arith.constant 0 : i32
    return %arg0, %arg1 : i32, i32
  }
}

</mosaic_0001>

<bundles_post_ra>
// kernel: student_s64_forward.5
= control target key start
LH: loop header
LB: loop body
LE: loop exit
PB: predicated region body
PF: predicated region fallthrough
CT: control target
= control target key end

     0   :  { %s287_s0 = inlined_call_operand.vmem [shape: f32[128,128], index: 0, kind: input, shape index: {}]   ;;  %s288_s1 = inlined_call_operand.vmem [shape: f32[1,128], index: 1, kind: input, shape index: {}]   ;;  %s289_s2 = inlined_call_operand.vmem [shape: f32[1,128], index: 2, kind: input, shape index: {}]   ;;  %s290_s3 = inlined_call_operand.vmem [shape: bf16[128,128], index: 3, kind: output, shape index: {}]  }
   0x1   :  { %v14_v0 = vld [vmem:[%s287_s0] sm:$0xff]  ;;  %v15_v1 = vld [vmem:[%s287_s0 + $0x8] sm:$0xff]  ;;  %v16_v4 = vld [vmem:[%s287_s0 + $0x10] sm:$0xff] }
   0x2   :  { %v169_v2 = vld [vmem:[%s288_s1] ss:$0 sm:$0xff]  ;;  %v17_v5 = vld [vmem:[%s287_s0 + $0x18] sm:$0xff]  ;;  %v19_v11 = vld [vmem:[%s287_s0 + $0x28] sm:$0xff] }
   0x3   :  { %v203_v3 = vld [vmem:[%s289_s2] ss:$0 sm:$0xff]  ;;  %v34_v7 = vmul.f32 %v169_v2, %v14_v0  ;;  %v35_v8 = vmul.f32 %v169_v2, %v15_v1  ;;  %v36_v9 = vmul.f32 %v169_v2, %v16_v4  ;;  %v37_v10 = vmul.f32 %v169_v2, %v17_v5  ;;  %v20_v12 = vld [vmem:[%s287_s0 + $0x30] sm:$0xff]  ;;  %v21_v13 = vld [vmem:[%s287_s0 + $0x38] sm:$0xff] }
   0x4   :  { %v18_v6 = vld [vmem:[%s287_s0 + $0x20] sm:$0xff]  ;;  %v39_v15 = vmul.f32 %v169_v2, %v19_v11  ;;  %v40_v16 = vmul.f32 %v169_v2, %v20_v12  ;;  %v41_v17 = vmul.f32 %v169_v2, %v21_v13  ;;  %v23_v27 = vld [vmem:[%s287_s0 + $0x48] sm:$0xff]  ;;  %v24_v32 = vld [vmem:[%s287_s0 + $0x50] sm:$0xff] }
   0x5   :  { %v38_v14 = vmul.f32 %v169_v2, %v18_v6  ;;  %v54_v18 = vadd.f32 %v203_v3, %v34_v7  ;;  %v55_v19 = vadd.f32 %v203_v3, %v35_v8  ;;  %v56_v20 = vadd.f32 %v203_v3, %v36_v9  ;;  %v22_v26 = vld [vmem:[%s287_s0 + $0x40] sm:$0xff]  ;;  %v25_v33 = vld [vmem:[%s287_s0 + $0x58] sm:$0xff]  ;;  %v27_v39 = vld [vmem:[%s287_s0 + $0x68] sm:$0xff] }
   0x6   :  { %v57_v21 = vadd.f32 %v203_v3, %v37_v10  ;;  %v59_v23 = vadd.f32 %v203_v3, %v39_v15  ;;  %v60_v24 = vadd.f32 %v203_v3, %v40_v16  ;;  %v61_v25 = vadd.f32 %v203_v3, %v41_v17  ;;  %v26_v38 = vld [vmem:[%s287_s0 + $0x60] sm:$0xff]  ;;  %v28_v44 = vld [vmem:[%s287_s0 + $0x70] sm:$0xff]  ;;  %v29_v45 = vld [vmem:[%s287_s0 + $0x78] sm:$0xff] }
   0x7   :  { %v58_v22 = vadd.f32 %v203_v3, %v38_v14  ;;  %v70_v28 = vmax.f32 %v54_v18, 0.0  ;;  %v71_v29 = vmax.f32 %v55_v19, 0.0  ;;  %v72_v30 = vmax.f32 %v56_v20, 0.0 }
   0x8   :  { %v73_v31 = vmax.f32 %v57_v21, 0.0  ;;  %v75_v35 = vmax.f32 %v59_v23, 0.0  ;;  %v76_v36 = vmax.f32 %v60_v24, 0.0  ;;  %v77_v37 = vmax.f32 %v61_v25, 0.0 }
   0x9   :  { %v74_v34 = vmax.f32 %v58_v22, 0.0  ;;  %v125_v40 = vpack.c.bf16 %v71_v29, %v70_v28  ;;  %v42_v42 = vmul.f32 %v169_v2, %v22_v26  ;;  %v43_v43 = vmul.f32 %v169_v2, %v23_v27 }
   0xa   :  { %v130_v41 = vpack.c.bf16 %v73_v31, %v72_v30  ;;  %v140_v47 = vpack.c.bf16 %v77_v37, %v76_v36  ;;  %v44_v48 = vmul.f32 %v169_v2, %v24_v32  ;;  %v45_v49 = vmul.f32 %v169_v2, %v25_v33 }
   0xb   :  { %v135_v46 = vpack.c.bf16 %v75_v35, %v74_v34  ;;  %126 = vst [vmem:[%s290_s3] sm:$0xff] %v125_v40   ;;  %v62_v50 = vadd.f32 %v203_v3, %v42_v42  ;;  %v63_v51 = vadd.f32 %v203_v3, %v43_v43  ;;  %v46_v52 = vmul.f32 %v169_v2, %v26_v38 }
   0xc   :  { %v47_v53 = vmul.f32 %v169_v2, %v27_v39  ;;  %162 = vst [vmem:[%s290_s3 + $0x8] sm:$0xff] %v130_v41   ;;  %v64_v54 = vadd.f32 %v203_v3, %v44_v48  ;;  %v65_v55 = vadd.f32 %v203_v3, %v45_v49  ;;  %v48_v56 = vmul.f32 %v169_v2, %v28_v44 }
   0xd   :  { %v49_v57 = vmul.f32 %v169_v2, %v29_v45  ;;  %163 = vst [vmem:[%s290_s3 + $0x10] sm:$0xff] %v135_v46   ;;  %v78_v58 = vmax.f32 %v62_v50, 0.0  ;;  %v79_v59 = vmax.f32 %v63_v51, 0.0  ;;  %v66_v60 = vadd.f32 %v203_v3, %v46_v52 }
   0xe   :  { %v67_v61 = vadd.f32 %v203_v3, %v47_v53  ;;  %164 = vst [vmem:[%s290_s3 + $0x18] sm:$0xff] %v140_v47   ;;  %v80_v62 = vmax.f32 %v64_v54, 0.0  ;;  %v81_v63 = vmax.f32 %v65_v55, 0.0  ;;  %v68_v0 = vadd.f32 %v203_v3, %v48_v56 }
   0xf   :  { %v69_v1 = vadd.f32 %v203_v3, %v49_v57  ;;  %v145_v2 = vpack.c.bf16 %v79_v59, %v78_v58  ;;  %v82_v4 = vmax.f32 %v66_v60, 0.0 }
  0x10   :  { %v83_v5 = vmax.f32 %v67_v61, 0.0  ;;  %v150_v6 = vpack.c.bf16 %v81_v63, %v80_v62  ;;  %v84_v7 = vmax.f32 %v68_v0, 0.0 }
  0x11   :  { %v85_v8 = vmax.f32 %v69_v1, 0.0  ;;  %165 = vst [vmem:[%s290_s3 + $0x20] sm:$0xff] %v145_v2  }
  0x12   :  { %v155_v9 = vpack.c.bf16 %v83_v5, %v82_v4  ;;  %166 = vst [vmem:[%s290_s3 + $0x28] sm:$0xff] %v150_v6  }
  0x13   :  { %v160_v10 = vpack.c.bf16 %v85_v8, %v84_v7 }
  0x14   :  { %167 = vst [vmem:[%s290_s3 + $0x30] sm:$0xff] %v155_v9  }
  0x15   :  { %168 = vst [vmem:[%s290_s3 + $0x38] sm:$0xff] %v160_v10  }

// kernel: student_s64_forward.7
= control target key start
LH: loop header
LB: loop body
LE: loop exit
PB: predicated region body
PF: predicated region fallthrough
CT: control target
= control target key end

     0   :  { %s248_s0 = inlined_call_operand.vmem [shape: f32[128,128], index: 0, kind: input, shape index: {}, may-alias: {0,3}]   ;;  %s249_s1 = inlined_call_operand.vmem [shape: f32[1,128], index: 1, kind: input, shape index: {}]   ;;  %s250_s2 = inlined_call_operand.vmem [shape: f32[1,128], index: 2, kind: input, shape index: {}]   ;;  %s251_s3 = inlined_call_operand.vmem [shape: f32[128,128], index: 3, kind: output, shape index: {}, may-alias: {0,3}]  }
   0x1   :  { %v14_v0 = vld [vmem:[%s248_s0] sm:$0xff]  ;;  %v15_v3 = vld [vmem:[%s248_s0 + $0x8] sm:$0xff]  ;;  %v16_v6 = vld [vmem:[%s248_s0 + $0x10] sm:$0xff] }
   0x2   :  { %v106_v1 = vld [vmem:[%s249_s1] ss:$0 sm:$0xff]  ;;  %v17_v7 = vld [vmem:[%s248_s0 + $0x18] sm:$0xff]  ;;  %v19_v12 = vld [vmem:[%s248_s0 + $0x28] sm:$0xff] }
   0x3   :  { %v137_v2 = vld [vmem:[%s250_s2] ss:$0 sm:$0xff]  ;;  %v34_v4 = vmul.f32 %v106_v1, %v14_v0  ;;  %v35_v5 = vmul.f32 %v106_v1, %v15_v3  ;;  %v36_v9 = vmul.f32 %v106_v1, %v16_v6  ;;  %v37_v10 = vmul.f32 %v106_v1, %v17_v7  ;;  %v20_v13 = vld [vmem:[%s248_s0 + $0x30] sm:$0xff]  ;;  %v21_v14 = vld [vmem:[%s248_s0 + $0x38] sm:$0xff] }
   0x4   :  { %v18_v8 = vld [vmem:[%s248_s0 + $0x20] sm:$0xff]  ;;  %v39_v17 = vmul.f32 %v106_v1, %v19_v12  ;;  %v40_v18 = vmul.f32 %v106_v1, %v20_v13  ;;  %v41_v22 = vmul.f32 %v106_v1, %v21_v14  ;;  %v23_v24 = vld [vmem:[%s248_s0 + $0x48] sm:$0xff]  ;;  %v24_v29 = vld [vmem:[%s248_s0 + $0x50] sm:$0xff] }
   0x5   :  { %v38_v11 = vmul.f32 %v106_v1, %v18_v8  ;;  %v54_v15 = vadd.f32 %v137_v2, %v34_v4  ;;  %v55_v16 = vadd.f32 %v137_v2, %v35_v5  ;;  %v56_v19 = vadd.f32 %v137_v2, %v36_v9  ;;  %v22_v23 = vld [vmem:[%s248_s0 + $0x40] sm:$0xff]  ;;  %v25_v30 = vld [vmem:[%s248_s0 + $0x58] sm:$0xff]  ;;  %v27_v35 = vld [vmem:[%s248_s0 + $0x68] sm:$0xff] }
   0x6   :  { %v57_v20 = vadd.f32 %v137_v2, %v37_v10  ;;  %v59_v27 = vadd.f32 %v137_v2, %v39_v17  ;;  %v60_v28 = vadd.f32 %v137_v2, %v40_v18  ;;  %v26_v31 = vld [vmem:[%s248_s0 + $0x60] sm:$0xff]  ;;  %v61_v34 = vadd.f32 %v137_v2, %v41_v22  ;;  %v28_v36 = vld [vmem:[%s248_s0 + $0x70] sm:$0xff] }
   0x7   :  { %v58_v21 = vadd.f32 %v137_v2, %v38_v11  ;;  %v70_v25 = vmax.f32 %v54_v15, 0.0  ;;  %v71_v26 = vmax.f32 %v55_v16, 0.0  ;;  %v72_v32 = vmax.f32 %v56_v19, 0.0 }
   0x8   :  { %v73_v33 = vmax.f32 %v57_v20, 0.0  ;;  %v75_v38 = vmax.f32 %v59_v27, 0.0  ;;  %v42_v39 = vmul.f32 %v106_v1, %v22_v23  ;;  %v43_v40 = vmul.f32 %v106_v1, %v23_v24 }
   0x9   :  { %86 = vst [vmem:[%s251_s3] sm:$0xff] %v70_v25  ;;  %v74_v37 = vmax.f32 %v58_v21, 0.0  ;;  %v76_v42 = vmax.f32 %v60_v28, 0.0  ;;  %v44_v43 = vmul.f32 %v106_v1, %v24_v29  ;;  %v45_v44 = vmul.f32 %v106_v1, %v25_v30 }
   0xa   :  { %v46_v45 = vmul.f32 %v106_v1, %v26_v31  ;;  %v62_v46 = vadd.f32 %v137_v2, %v42_v39  ;;  %v63_v47 = vadd.f32 %v137_v2, %v43_v40  ;;  %v47_v48 = vmul.f32 %v106_v1, %v27_v35 }
   0xb   :  { %v48_v49 = vmul.f32 %v106_v1, %v28_v36  ;;  %v77_v50 = vmax.f32 %v61_v34, 0.0  ;;  %v64_v51 = vadd.f32 %v137_v2, %v44_v43  ;;  %v65_v52 = vadd.f32 %v137_v2, %v45_v44 }
   0xc   :  { %v78_v54 = vmax.f32 %v62_v46, 0.0  ;;  %v66_v55 = vadd.f32 %v137_v2, %v46_v45  ;;  %v79_v56 = vmax.f32 %v63_v47, 0.0  ;;  %v67_v57 = vadd.f32 %v137_v2, %v47_v48 }
   0xd   :  { %v80_v58 = vmax.f32 %v64_v51, 0.0  ;;  %v68_v59 = vadd.f32 %v137_v2, %v48_v49  ;;  %v81_v60 = vmax.f32 %v65_v52, 0.0 }
   0xe   :  { %v82_v62 = vmax.f32 %v66_v55, 0.0  ;;  %v83_v63 = vmax.f32 %v67_v57, 0.0 }
   0xf   :  { %v84_v0 = vmax.f32 %v68_v59, 0.0 }
  0x10   :  { %v29_v41 = vld [vmem:[%s248_s0 + $0x78] sm:$0xff] }
  0x11   :  { %87 = vst [vmem:[%s251_s3 + $0x8] sm:$0xff] %v71_v26  ;;  %v49_v53 = vmul.f32 %v106_v1, %v29_v41 }
  0x12   :  { %88 = vst [vmem:[%s251_s3 + $0x10] sm:$0xff] %v72_v32 }
  0x13   :  { %89 = vst [vmem:[%s251_s3 + $0x18] sm:$0xff] %v73_v33  ;;  %v69_v61 = vadd.f32 %v137_v2, %v49_v53 }
  0x14   :  { %90 = vst [vmem:[%s251_s3 + $0x20] sm:$0xff] %v74_v37 }
  0x15   :  { %91 = vst [vmem:[%s251_s3 + $0x28] sm:$0xff] %v75_v38  ;;  %v85_v1 = vmax.f32 %v69_v61, 0.0 }
  0x16   :  { %92 = vst [vmem:[%s251_s3 + $0x30] sm:$0xff] %v76_v42 }
  0x17   :  { %93 = vst [vmem:[%s251_s3 + $0x38] sm:$0xff] %v77_v50 }
  0x18   :  { %94 = vst [vmem:[%s251_s3 + $0x40] sm:$0xff] %v78_v54 }
  0x19   :  { %95 = vst [vmem:[%s251_s3 + $0x48] sm:$0xff] %v79_v56 }
  0x1a   :  { %96 = vst [vmem:[%s251_s3 + $0x50] sm:$0xff] %v80_v58 }
  0x1b   :  { %97 = vst [vmem:[%s251_s3 + $0x58] sm:$0xff] %v81_v60 }
  0x1c   :  { %98 = vst [vmem:[%s251_s3 + $0x60] sm:$0xff] %v82_v62 }
  0x1d   :  { %99 = vst [vmem:[%s251_s3 + $0x68] sm:$0xff] %v83_v63 }
  0x1e   :  { %100 = vst [vmem:[%s251_s3 + $0x70] sm:$0xff] %v84_v0 }
  0x1f   :  { %101 = vst [vmem:[%s251_s3 + $0x78] sm:$0xff] %v85_v1 }

// kernel: student_s64_forward.4
= control target key start
LH: loop header
LB: loop body
LE: loop exit
PB: predicated region body
PF: predicated region fallthrough
CT: control target
= control target key end

     0   :  { %s3187_s1 = inlined_call_operand.vmem [shape: bf16[1152,128], index: 1, kind: input, shape index: {}]   ;;  %s3188_s0 = inlined_call_operand.vmem [shape: bf16[128,1152], index: 0, kind: input, shape index: {}]   ;;  %s3189_s2 = inlined_call_operand.vmem [shape: f32[128,128], index: 2, kind: output, shape index: {0}]   ;;  %s3190_s3 = inlined_call_operand.vmem [shape: f32[8,128], index: 3, kind: output, shape index: {1}]   ;;  %s3191_s4 = inlined_call_operand.vmem [shape: f32[8,128], index: 4, kind: output, shape index: {2}]  }
   0x1   :  { %v2287_v0 = vld [vmem:[%s3187_s1 + $0x38] sm:$0xff]  ;;  %v2286_v1 = vld [vmem:[%s3187_s1 + $0x30] sm:$0xff]  ;;  %v2285_v2 = vld [vmem:[%s3187_s1 + $0x28] sm:$0xff] }
   0x2   :  { %2352 = vmatpush.bf16.msra.mxu1 %v2287_v0  ;;  %2353 = vmatpush.bf16.msra.mxu2 %v2287_v0  ;;  %v2284_v3 = vld [vmem:[%s3187_s1 + $0x20] sm:$0xff]  ;;  %v2283_v4 = vld [vmem:[%s3187_s1 + $0x18] sm:$0xff]  ;;  %v2282_v5 = vld [vmem:[%s3187_s1 + $0x10] sm:$0xff] }
   0x3   :  { %2354 = vmatpush.bf16.msra.mxu3 %v2287_v0  ;;  %1038 = vmatpush.bf16.msra.mxu0 %v2287_v0  ;;  %v2281_v6 = vld [vmem:[%s3187_s1 + $0x8] sm:$0xff]  ;;  %v2280_v7 = vld [vmem:[%s3187_s1] sm:$0xff]  ;;  %v1706_v8 = vld [vmem:[%s3188_s0 + $0x90] sm:$0xf] }
   0x4   :  { %v2230_v9 = vld [vmem:[%s3188_s0 + $0xb0] sm:$0xf0]  ;;  %v1778_v10 = vld [vmem:[%s3188_s0 + $0x120] sm:$0xf]  ;;  %v2248_v11 = vld [vmem:[%s3188_s0 + $0x140] sm:$0xf0] }
   0x5   :  { %v1850_v12 = vld [vmem:[%s3188_s0 + $0x1b0] sm:$0xf]  ;;  %v2266_v13 = vld [vmem:[%s3188_s0 + $0x1d0] sm:$0xf0]  ;;  %v1634_v14 = vld [vmem:[%s3188_s0] sm:$0xf]  ;;  %v1707_v18 = vor.u32 %v2230_v9, %v1706_v8  ;;  %v1779_v19 = vor.u32 %v2248_v11, %v1778_v10 }
   0x6   :  { %2355 = vmatpush.bf16.msra.mxu1 %v2286_v1  ;;  %2356 = vmatpush.bf16.msra.mxu2 %v2286_v1  ;;  %v2212_v15 = vld [vmem:[%s3188_s0 + $0x20] sm:$0xf0]  ;;  %v2303_v16 = vld [vmem:[%s3187_s1 + $0xb8] sm:$0xff]  ;;  %v1851_v20 = vor.u32 %v2266_v13, %v1850_v12  ;;  %v2302_v24 = vld [vmem:[%s3187_s1 + $0xb0] sm:$0xff] }
   0x7   :  { %2357 = vmatpush.bf16.msra.mxu3 %v2286_v1  ;;  %1039 = vmatpush.bf16.msra.mxu0 %v2286_v1  ;;  %v2295_v17 = vld [vmem:[%s3187_s1 + $0x78] sm:$0xff]  ;;  %v1635_v21 = vor.u32 %v2212_v15, %v1634_v14  ;;  %v2294_v25 = vld [vmem:[%s3187_s1 + $0x70] sm:$0xff]  ;;  %v2301_v28 = vld [vmem:[%s3187_s1 + $0xa8] sm:$0xff] }
   0x8   :  { %v2311_v22 = vld [vmem:[%s3187_s1 + $0xf8] sm:$0xff]  ;;  %v2310_v26 = vld [vmem:[%s3187_s1 + $0xf0] sm:$0xff]  ;;  %v2293_v29 = vld [vmem:[%s3187_s1 + $0x68] sm:$0xff] }
   0x9   :  { %v2319_v23 = vld [vmem:[%s3187_s1 + $0x138] sm:$0xff]  ;;  %v2318_v27 = vld [vmem:[%s3187_s1 + $0x130] sm:$0xff]  ;;  %v2309_v30 = vld [vmem:[%s3187_s1 + $0xe8] sm:$0xff] }
   0xa   :  { %2358 = vmatpush.bf16.msra.mxu1 %v2285_v2  ;;  %2359 = vmatpush.bf16.msra.mxu2 %v2285_v2  ;;  %v2317_v31 = vld [vmem:[%s3187_s1 + $0x128] sm:$0xff]  ;;  %v2300_v32 = vld [vmem:[%s3187_s1 + $0xa0] sm:$0xff]  ;;  %v1742_v36 = vld [vmem:[%s3188_s0 + $0xd8] sm:$0xf] }
   0xb   :  { %2360 = vmatpush.bf16.msra.mxu3 %v2285_v2  ;;  %1040 = vmatpush.bf16.msra.mxu0 %v2285_v2  ;;  %v2292_v33 = vld [vmem:[%s3187_s1 + $0x60] sm:$0xff]  ;;  %v2239_v37 = vld [vmem:[%s3188_s0 + $0xf8] sm:$0xf0]  ;;  %v1814_v38 = vld [vmem:[%s3188_s0 + $0x168] sm:$0xf] }
   0xc   :  { %v2308_v34 = vld [vmem:[%s3187_s1 + $0xe0] sm:$0xff]  ;;  %v2257_v39 = vld [vmem:[%s3188_s0 + $0x188] sm:$0xf0]  ;;  %v1886_v40 = vld [vmem:[%s3188_s0 + $0x1f8] sm:$0xf]  ;;  %v1743_v46 = vor.u32 %v2239_v37, %v1742_v36 }
   0xd   :  { %v2316_v35 = vld [vmem:[%s3187_s1 + $0x120] sm:$0xff]  ;;  %v2275_v41 = vld [vmem:[%s3188_s0 + $0x218] sm:$0xf0]  ;;  %v1670_v42 = vld [vmem:[%s3188_s0 + $0x48] sm:$0xf]  ;;  %v1815_v47 = vor.u32 %v2257_v39, %v1814_v38 }
   0xe   :  { %2361 = vmatpush.bf16.msra.mxu1 %v2284_v3  ;;  %2362 = vmatpush.bf16.msra.mxu2 %v2284_v3  ;;  %v2221_v43 = vld [vmem:[%s3188_s0 + $0x68] sm:$0xf0]  ;;  %v2299_v44 = vld [vmem:[%s3187_s1 + $0x98] sm:$0xff]  ;;  %v1887_v48 = vor.u32 %v2275_v41, %v1886_v40  ;;  %v2298_v52 = vld [vmem:[%s3187_s1 + $0x90] sm:$0xff] }
   0xf   :  { %2363 = vmatpush.bf16.msra.mxu3 %v2284_v3  ;;  %1041 = vmatpush.bf16.msra.mxu0 %v2284_v3  ;;  %v2291_v45 = vld [vmem:[%s3187_s1 + $0x58] sm:$0xff]  ;;  %v1671_v49 = vor.u32 %v2221_v43, %v1670_v42  ;;  %v2290_v53 = vld [vmem:[%s3187_s1 + $0x50] sm:$0xff]  ;;  %v2297_v56 = vld [vmem:[%s3187_s1 + $0x88] sm:$0xff] }
  0x10   :  { %v2307_v50 = vld [vmem:[%s3187_s1 + $0xd8] sm:$0xff]  ;;  %v2306_v54 = vld [vmem:[%s3187_s1 + $0xd0] sm:$0xff]  ;;  %v2289_v57 = vld [vmem:[%s3187_s1 + $0x48] sm:$0xff] }
  0x11   :  { %v2315_v51 = vld [vmem:[%s3187_s1 + $0x118] sm:$0xff]  ;;  %v2314_v55 = vld [vmem:[%s3187_s1 + $0x110] sm:$0xff]  ;;  %v2305_v58 = vld [vmem:[%s3187_s1 + $0xc8] sm:$0xff] }
  0x12   :  { %2364 = vmatpush.bf16.msra.mxu1 %v2283_v4  ;;  %2365 = vmatpush.bf16.msra.mxu2 %v2283_v4  ;;  %v2313_v59 = vld [vmem:[%s3187_s1 + $0x108] sm:$0xff]  ;;  %v2296_v60 = vld [vmem:[%s3187_s1 + $0x80] sm:$0xff]  ;;  %v2335_v2 = vld [vmem:[%s3187_s1 + $0x1b8] sm:$0xff] }
  0x13   :  { %2366 = vmatpush.bf16.msra.mxu3 %v2283_v4  ;;  %1042 = vmatpush.bf16.msra.mxu0 %v2283_v4  ;;  %v2288_v61 = vld [vmem:[%s3187_s1 + $0x40] sm:$0xff]  ;;  %v1636_v1 = vld [vmem:[%s3188_s0 + $0x24] sm:$0xf0]  ;;  %v2327_v3 = vld [vmem:[%s3187_s1 + $0x178] sm:$0xff] }
  0x14   :  { %v2208_v62 = vld [vmem:[%s3188_s0 + $0x4] sm:$0xf]  ;;  %v1642_v4 = vld [vmem:[%s3188_s0 + $0x8] sm:$0xf]  ;;  %v1650_v8 = vld [vmem:[%s3188_s0 + $0x10] sm:$0xf] }
  0x15   :  { %v2304_v63 = vld [vmem:[%s3187_s1 + $0xc0] sm:$0xff]  ;;  %v2214_v9 = vld [vmem:[%s3188_s0 + $0x30] sm:$0xf0]  ;;  %v2343_v10 = vld [vmem:[%s3187_s1 + $0x1f8] sm:$0xff]  ;;  %v1639_v12 = vor.u32 %v2208_v62, %v1636_v1 }
  0x16   :  { %2367 = vmatpush.bf16.msra.mxu1 %v2282_v5  ;;  %2368 = vmatpush.bf16.msra.mxu2 %v2282_v5  ;;  %v2312_v0 = vld [vmem:[%s3187_s1 + $0x100] sm:$0xff]  ;;  %v2351_v11 = vld [vmem:[%s3187_s1 + $0x238] sm:$0xff]  ;;  %v1651_v15 = vor.u32 %v2214_v9, %v1650_v8  ;;  %v2226_v40 = vld [vmem:[%s3188_s0 + $0x94] sm:$0xf] }
  0x17   :  { %2369 = vmatpush.bf16.msra.mxu3 %v2282_v5  ;;  %1043 = vmatpush.bf16.msra.mxu0 %v2282_v5  ;;  %v2213_v5 = vld [vmem:[%s3188_s0 + $0x28] sm:$0xf0]  ;;  %v2332_v36 = vld [vmem:[%s3187_s1 + $0x1a0] sm:$0xff]  ;;  %v1708_v41 = vld [vmem:[%s3188_s0 + $0xb4] sm:$0xf0] }
  0x18   :  { %v1643_v13 = vor.u32 %v2213_v5, %v1642_v4  ;;  %v2340_v37 = vld [vmem:[%s3187_s1 + $0x1e0] sm:$0xff]  ;;  %v1714_v42 = vld [vmem:[%s3188_s0 + $0x98] sm:$0xf]  ;;  %v2231_v43 = vld [vmem:[%s3188_s0 + $0xb8] sm:$0xf0] }
  0x19   :  { %v2324_v38 = vld [vmem:[%s3187_s1 + $0x160] sm:$0xff]  ;;  %v1758_v62 = vld [vmem:[%s3188_s0 + $0xe8] sm:$0xf]  ;;  %v2330_v4 = vld [vmem:[%s3187_s1 + $0x190] sm:$0xff] }
  0x1a   :  { %2370 = vmatpush.bf16.msra.mxu1 %v2281_v6  ;;  %2371 = vmatpush.bf16.msra.mxu2 %v2281_v6  ;;  %v2348_v39 = vld [vmem:[%s3187_s1 + $0x220] sm:$0xff]  ;;  %v2338_v5 = vld [vmem:[%s3187_s1 + $0x1d0] sm:$0xff]  ;;  %v1780_v9 = vld [vmem:[%s3188_s0 + $0x144] sm:$0xf0] }
  0x1b   :  { %2372 = vmatpush.bf16.msra.mxu3 %v2281_v6  ;;  %1044 = vmatpush.bf16.msra.mxu0 %v2281_v6  ;;  %v2209_v6 = vld [vmem:[%s3188_s0 + $0xc] sm:$0xf]  ;;  %v2244_v8 = vld [vmem:[%s3188_s0 + $0x124] sm:$0xf] }
  0x1e   :  { %2373 = vmatpush.bf16.msra.mxu1 %v2280_v7  ;;  %2374 = vmatpush.bf16.msra.mxu2 %v2280_v7 }
  0x1f   :  { %2375 = vmatpush.bf16.msra.mxu3 %v2280_v7  ;;  %1045 = vmatpush.bf16.msra.mxu0 %v2280_v7  ;;  %v1644_v7 = vld [vmem:[%s3188_s0 + $0x2c] sm:$0xf0] }
  0x20   :  { %v1647_v14 = vor.u32 %v2209_v6, %v1644_v7  ;;  %v2322_v6 = vld [vmem:[%s3187_s1 + $0x150] sm:$0xff] }
  0x21   :  { %1056 = vmatmul.bf16.vlgmr.msra.gmra.mxu1 %v1707_v18  ;;  %1066 = vmatmul.bf16.vlgmr.msra.gmra.mxu2 %v1779_v19  ;;  %v2342_v18 = vld [vmem:[%s3187_s1 + $0x1f0] sm:$0xff] }
  0x22   :  { %1136 = vmatpush.bf16.msrb.mxu2 %v2303_v16  ;;  %1087 = vmatpush.bf16.msrb.mxu1 %v2295_v17  ;;  %v2334_v16 = vld [vmem:[%s3187_s1 + $0x1b0] sm:$0xff] }
  0x23   :  { %1076 = vmatmul.bf16.vlgmr.msra.gmra.mxu3 %v1851_v20  ;;  %1046 = vmatmul.bf16.vlgmr.msra.gmra.mxu0 %v1635_v21  ;;  %v2326_v17 = vld [vmem:[%s3187_s1 + $0x170] sm:$0xff]  ;;  %v2333_v20 = vld [vmem:[%s3187_s1 + $0x1a8] sm:$0xff] }
  0x24   :  { %1185 = vmatpush.bf16.msrb.mxu3 %v2311_v22  ;;  %1234 = vmatpush.bf16.msrb.mxu0 %v2319_v23  ;;  %v2350_v19 = vld [vmem:[%s3187_s1 + $0x230] sm:$0xff]  ;;  %v2325_v21 = vld [vmem:[%s3187_s1 + $0x168] sm:$0xff] }
  0x25   :  { %v2341_v22 = vld [vmem:[%s3187_s1 + $0x1e8] sm:$0xff]  ;;  %v2346_v7 = vld [vmem:[%s3187_s1 + $0x210] sm:$0xff] }
  0x26   :  { %1137 = vmatpush.bf16.msrb.mxu2 %v2302_v24  ;;  %1088 = vmatpush.bf16.msrb.mxu1 %v2294_v25  ;;  %v2349_v23 = vld [vmem:[%s3187_s1 + $0x228] sm:$0xff]  ;;  %v1672_v25 = vld [vmem:[%s3188_s0 + $0x6c] sm:$0xf0] }
  0x27   :  { %v2217_v24 = vld [vmem:[%s3188_s0 + $0x4c] sm:$0xf] }
  0x28   :  { %1186 = vmatpush.bf16.msrb.mxu3 %v2310_v26  ;;  %1235 = vmatpush.bf16.msrb.mxu0 %v2318_v27  ;;  %v1678_v26 = vld [vmem:[%s3188_s0 + $0x50] sm:$0xf]  ;;  %v2222_v27 = vld [vmem:[%s3188_s0 + $0x70] sm:$0xf0] }
  0x2a   :  { %1138 = vmatpush.bf16.msrb.mxu2 %v2301_v28  ;;  %1089 = vmatpush.bf16.msrb.mxu1 %v2293_v29  ;;  %v2218_v28 = vld [vmem:[%s3188_s0 + $0x54] sm:$0xf]  ;;  %v1680_v29 = vld [vmem:[%s3188_s0 + $0x74] sm:$0xf0] }
  0x2c   :  { %1187 = vmatpush.bf16.msrb.mxu3 %v2309_v30  ;;  %1236 = vmatpush.bf16.msrb.mxu0 %v2317_v31  ;;  %v1686_v30 = vld [vmem:[%s3188_s0 + $0x58] sm:$0xf]  ;;  %v2223_v31 = vld [vmem:[%s3188_s0 + $0x78] sm:$0xf0] }
  0x2e   :  { %1139 = vmatpush.bf16.msrb.mxu2 %v2300_v32  ;;  %1090 = vmatpush.bf16.msrb.mxu1 %v2292_v33  ;;  %v1675_v32 = vor.u32 %v2217_v24, %v1672_v25  ;;  %v1679_v33 = vor.u32 %v2222_v27, %v1678_v26  ;;  %v2253_v24 = vld [vmem:[%s3188_s0 + $0x16c] sm:$0xf]  ;;  %v1816_v25 = vld [vmem:[%s3188_s0 + $0x18c] sm:$0xf0]  ;;  %v2258_v27 = vld [vmem:[%s3188_s0 + $0x190] sm:$0xf0] }
  0x2f   :  { %v1822_v26 = vld [vmem:[%s3188_s0 + $0x170] sm:$0xf] }
  0x30   :  { %1188 = vmatpush.bf16.msrb.mxu3 %v2308_v34  ;;  %1237 = vmatpush.bf16.msrb.mxu0 %v2316_v35  ;;  %v1683_v34 = vor.u32 %v2218_v28, %v1680_v29  ;;  %v1687_v35 = vor.u32 %v2223_v31, %v1686_v30  ;;  %v2254_v28 = vld [vmem:[%s3188_s0 + $0x174] sm:$0xf]  ;;  %v1824_v29 = vld [vmem:[%s3188_s0 + $0x194] sm:$0xf0]  ;;  %v2259_v31 = vld [vmem:[%s3188_s0 + $0x198] sm:$0xf0] }
  0x31   :  { %1061 = vmatmul.bf16.gmra.mxu1 %v1743_v46  ;;  %1071 = vmatmul.bf16.gmra.mxu2 %v1815_v47  ;;  %v1722_v46 = vld [vmem:[%s3188_s0 + $0xa0] sm:$0xf]  ;;  %v2232_v47 = vld [vmem:[%s3188_s0 + $0xc0] sm:$0xf0]  ;;  %v1830_v30 = vld [vmem:[%s3188_s0 + $0x178] sm:$0xf] }
  0x32   :  { %1140 = vmatpush.bf16.msrb.mxu2 %v2299_v44  ;;  %1091 = vmatpush.bf16.msrb.mxu1 %v2291_v45  ;;  %v2227_v44 = vld [vmem:[%s3188_s0 + $0x9c] sm:$0xf]  ;;  %v1716_v45 = vld [vmem:[%s3188_s0 + $0xbc] sm:$0xf0] }
  0x33   :  { %1081 = vmatmul.bf16.gmra.mxu3 %v1887_v48  ;;  %1051 = vmatmul.bf16.gmra.mxu0 %v1671_v49  ;;  %v1711_v48 = vor.u32 %v2226_v40, %v1708_v41  ;;  %v1715_v49 = vor.u32 %v2231_v43, %v1714_v42  ;;  %v2262_v40 = vld [vmem:[%s3188_s0 + $0x1b4] sm:$0xf]  ;;  %v1852_v41 = vld [vmem:[%s3188_s0 + $0x1d4] sm:$0xf0]  ;;  %v2267_v43 = vld [vmem:[%s3188_s0 + $0x1d8] sm:$0xf0] }
  0x34   :  { %1189 = vmatpush.bf16.msrb.mxu3 %v2307_v50  ;;  %1238 = vmatpush.bf16.msrb.mxu0 %v2315_v51  ;;  %v1719_v50 = vor.u32 %v2227_v44, %v1716_v45  ;;  %v1723_v51 = vor.u32 %v2232_v47, %v1722_v46  ;;  %v1858_v42 = vld [vmem:[%s3188_s0 + $0x1b8] sm:$0xf]  ;;  %v2263_v44 = vld [vmem:[%s3188_s0 + $0x1bc] sm:$0xf]  ;;  %v1860_v45 = vld [vmem:[%s3188_s0 + $0x1dc] sm:$0xf0] }
  0x35   :  { %v1866_v46 = vld [vmem:[%s3188_s0 + $0x1c0] sm:$0xf]  ;;  %v2268_v47 = vld [vmem:[%s3188_s0 + $0x1e0] sm:$0xf0] }
  0x36   :  { %1141 = vmatpush.bf16.msrb.mxu2 %v2298_v52  ;;  %1092 = vmatpush.bf16.msrb.mxu1 %v2290_v53  ;;  %v2331_v52 = vld [vmem:[%s3187_s1 + $0x198] sm:$0xff] }
  0x37   :  { %v2339_v53 = vld [vmem:[%s3187_s1 + $0x1d8] sm:$0xff] }
  0x38   :  { %1190 = vmatpush.bf16.msrb.mxu3 %v2306_v54  ;;  %1239 = vmatpush.bf16.msrb.mxu0 %v2314_v55  ;;  %v2323_v54 = vld [vmem:[%s3187_s1 + $0x158] sm:$0xff] }
  0x39   :  { %v2347_v55 = vld [vmem:[%s3187_s1 + $0x218] sm:$0xff] }
  0x3a   :  { %1142 = vmatpush.bf16.msrb.mxu2 %v2297_v56  ;;  %1093 = vmatpush.bf16.msrb.mxu1 %v2289_v57  ;;  %v2235_v56 = vld [vmem:[%s3188_s0 + $0xdc] sm:$0xf]  ;;  %v1744_v57 = vld [vmem:[%s3188_s0 + $0xfc] sm:$0xf0] }
  0x3c   :  { %1191 = vmatpush.bf16.msrb.mxu3 %v2305_v58  ;;  %1240 = vmatpush.bf16.msrb.mxu0 %v2313_v59  ;;  %v1750_v58 = vld [vmem:[%s3188_s0 + $0xe0] sm:$0xf]  ;;  %v2240_v59 = vld [vmem:[%s3188_s0 + $0x100] sm:$0xf0] }
  0x3d   :  { %v1751_v1 = vor.u32 %v2240_v59, %v1750_v58  ;;  %v2271_v58 = vld [vmem:[%s3188_s0 + $0x1fc] sm:$0xf]  ;;  %v1888_v59 = vld [vmem:[%s3188_s0 + $0x21c] sm:$0xf0] }
  0x3e   :  { %1143 = vmatpush.bf16.msrb.mxu2 %v2296_v60  ;;  %1094 = vmatpush.bf16.msrb.mxu1 %v2288_v61  ;;  %v2236_v60 = vld [vmem:[%s3188_s0 + $0xe4] sm:$0xf]  ;;  %v1752_v61 = vld [vmem:[%s3188_s0 + $0x104] sm:$0xf0] }
  0x40   :  { %1192 = vmatpush.bf16.msrb.mxu3 %v2304_v63  ;;  %1241 = vmatpush.bf16.msrb.mxu0 %v2312_v0  ;;  %v2241_v63 = vld [vmem:[%s3188_s0 + $0x108] sm:$0xf0]  ;;  %v1747_v0 = vor.u32 %v2235_v56, %v1744_v57 }
  0x41   :  { %1095 = vmatmul.bf16.vlgmr.msrb.gmra.mxu1 %v1639_v12  ;;  %1144 = vmatmul.bf16.vlgmr.msrb.gmra.mxu2 %v1643_v13  ;;  %v2245_v12 = vld [vmem:[%s3188_s0 + $0x12c] sm:$0xf]  ;;  %v1788_v13 = vld [vmem:[%s3188_s0 + $0x14c] sm:$0xf0] }
  0x42   :  { %1332 = vmatpush.bf16.msra.mxu2 %v2335_v2  ;;  %1283 = vmatpush.bf16.msra.mxu1 %v2327_v3  ;;  %v1755_v2 = vor.u32 %v2236_v60, %v1752_v61  ;;  %v1759_v3 = vor.u32 %v2241_v63, %v1758_v62  ;;  %v1894_v60 = vld [vmem:[%s3188_s0 + $0x200] sm:$0xf]  ;;  %v2276_v61 = vld [vmem:[%s3188_s0 + $0x220] sm:$0xf0]  ;;  %v1896_v63 = vld [vmem:[%s3188_s0 + $0x224] sm:$0xf0] }
  0x43   :  { %1193 = vmatmul.bf16.vlgmr.msrb.gmra.mxu3 %v1647_v14  ;;  %1242 = vmatmul.bf16.vlgmr.msrb.gmra.mxu0 %v1651_v15  ;;  %v1794_v14 = vld [vmem:[%s3188_s0 + $0x130] sm:$0xf]  ;;  %v2250_v15 = vld [vmem:[%s3188_s0 + $0x150] sm:$0xf0]  ;;  %v2272_v62 = vld [vmem:[%s3188_s0 + $0x204] sm:$0xf] }
  0x44   :  { %1381 = vmatpush.bf16.msra.mxu3 %v2343_v10  ;;  %1430 = vmatpush.bf16.msra.mxu0 %v2351_v11  ;;  %v1786_v10 = vld [vmem:[%s3188_s0 + $0x128] sm:$0xf]  ;;  %v2249_v11 = vld [vmem:[%s3188_s0 + $0x148] sm:$0xf0] }
  0x46   :  { %1333 = vmatpush.bf16.msra.mxu2 %v2334_v16  ;;  %1284 = vmatpush.bf16.msra.mxu1 %v2326_v17  ;;  %v1783_v16 = vor.u32 %v2244_v8, %v1780_v9  ;;  %v1787_v17 = vor.u32 %v2249_v11, %v1786_v10 }
  0x48   :  { %1382 = vmatpush.bf16.msra.mxu3 %v2342_v18  ;;  %1431 = vmatpush.bf16.msra.mxu0 %v2350_v19  ;;  %v1791_v18 = vor.u32 %v2245_v12, %v1788_v13  ;;  %v1795_v19 = vor.u32 %v2250_v15, %v1794_v14  ;;  %v2210_v14 = vld [vmem:[%s3188_s0 + $0x14] sm:$0xf]  ;;  %v1652_v15 = vld [vmem:[%s3188_s0 + $0x34] sm:$0xf0] }
  0x4a   :  { %1334 = vmatpush.bf16.msra.mxu2 %v2333_v20  ;;  %1285 = vmatpush.bf16.msra.mxu1 %v2325_v21  ;;  %v2329_v20 = vld [vmem:[%s3187_s1 + $0x188] sm:$0xff] }
  0x4b   :  { %v2337_v21 = vld [vmem:[%s3187_s1 + $0x1c8] sm:$0xff] }
  0x4c   :  { %1383 = vmatpush.bf16.msra.mxu3 %v2341_v22  ;;  %1432 = vmatpush.bf16.msra.mxu0 %v2349_v23  ;;  %v2321_v22 = vld [vmem:[%s3187_s1 + $0x148] sm:$0xff] }
  0x4d   :  { %v2345_v23 = vld [vmem:[%s3187_s1 + $0x208] sm:$0xff] }
  0x4e   :  { %1335 = vmatpush.bf16.msra.mxu2 %v2332_v36  ;;  %1286 = vmatpush.bf16.msra.mxu1 %v2324_v38  ;;  %v2328_v36 = vld [vmem:[%s3187_s1 + $0x180] sm:$0xff] }
  0x4f   :  { %v2320_v38 = vld [vmem:[%s3187_s1 + $0x140] sm:$0xff] }
  0x50   :  { %1384 = vmatpush.bf16.msra.mxu3 %v2340_v37  ;;  %1433 = vmatpush.bf16.msra.mxu0 %v2348_v39  ;;  %v2336_v37 = vld [vmem:[%s3187_s1 + $0x1c0] sm:$0xff] }
  0x51   :  { %1100 = vmatmul.bf16.gmra.mxu1 %v1675_v32  ;;  %1149 = vmatmul.bf16.gmra.mxu2 %v1679_v33  ;;  %v1819_v32 = vor.u32 %v2253_v24, %v1816_v25  ;;  %v1823_v33 = vor.u32 %v2258_v27, %v1822_v26  ;;  %v2344_v39 = vld [vmem:[%s3187_s1 + $0x200] sm:$0xff]  ;;  %v1655_v24 = vor.u32 %v2210_v14, %v1652_v15 }
  0x52   :  { %1336 = vmatpush.bf16.msra.mxu2 %v2331_v52  ;;  %1287 = vmatpush.bf16.msra.mxu1 %v2323_v54  ;;  %v1867_v52 = vor.u32 %v2268_v47, %v1866_v46  ;;  %v2225_v46 = vld [vmem:[%s3188_s0 + $0x88] sm:$0xf0]  ;;  %v2228_v14 = vld [vmem:[%s3188_s0 + $0xa4] sm:$0xf] }
  0x53   :  { %1198 = vmatmul.bf16.gmra.mxu3 %v1683_v34  ;;  %1247 = vmatmul.bf16.gmra.mxu0 %v1687_v35  ;;  %v1827_v34 = vor.u32 %v2254_v28, %v1824_v29  ;;  %v1831_v35 = vor.u32 %v2259_v31, %v1830_v30 }
  0x54   :  { %1385 = vmatpush.bf16.msra.mxu3 %v2339_v53  ;;  %1434 = vmatpush.bf16.msra.mxu0 %v2347_v55 }
  0x56   :  { %1337 = vmatpush.bf16.msra.mxu2 %v2330_v4  ;;  %1288 = vmatpush.bf16.msra.mxu1 %v2322_v6  ;;  %v1891_v4 = vor.u32 %v2271_v58, %v1888_v59 }
  0x58   :  { %1386 = vmatpush.bf16.msra.mxu3 %v2338_v5  ;;  %1435 = vmatpush.bf16.msra.mxu0 %v2346_v7  ;;  %v1895_v5 = vor.u32 %v2276_v61, %v1894_v60  ;;  %v1899_v7 = vor.u32 %v2272_v62, %v1896_v63 }
  0x5a   :  { %1338 = vmatpush.bf16.msra.mxu2 %v2329_v20  ;;  %1289 = vmatpush.bf16.msra.mxu1 %v2321_v22  ;;  %v1666_v20 = vld [vmem:[%s3188_s0 + $0x20] sm:$0xf] }
  0x5c   :  { %1387 = vmatpush.bf16.msra.mxu3 %v2337_v21  ;;  %1436 = vmatpush.bf16.msra.mxu0 %v2345_v23  ;;  %v2216_v21 = vld [vmem:[%s3188_s0 + $0x40] sm:$0xf0] }
  0x5d   :  { %v1667_v28 = vor.u32 %v2216_v21, %v1666_v20  ;;  %v2234_v20 = vld [vmem:[%s3188_s0 + $0xd0] sm:$0xf0] }
  0x5e   :  { %1339 = vmatpush.bf16.msra.mxu2 %v2328_v36  ;;  %1290 = vmatpush.bf16.msra.mxu1 %v2320_v38  ;;  %v2219_v38 = vld [vmem:[%s3188_s0 + $0x5c] sm:$0xf] }
  0x60   :  { %1388 = vmatpush.bf16.msra.mxu3 %v2336_v37  ;;  %1437 = vmatpush.bf16.msra.mxu0 %v2344_v39  ;;  %v1688_v39 = vld [vmem:[%s3188_s0 + $0x7c] sm:$0xf0] }
  0x61   :  { %1105 = vmatmul.bf16.gmra.mxu1 %v1711_v48  ;;  %1154 = vmatmul.bf16.gmra.mxu2 %v1715_v49  ;;  %v1855_v48 = vor.u32 %v2262_v40, %v1852_v41  ;;  %v1859_v49 = vor.u32 %v2267_v43, %v1858_v42  ;;  %v1694_v41 = vld [vmem:[%s3188_s0 + $0x60] sm:$0xf]  ;;  %v2224_v42 = vld [vmem:[%s3188_s0 + $0x80] sm:$0xf0] }
  0x62   :  { %v2220_v43 = vld [vmem:[%s3188_s0 + $0x64] sm:$0xf] }
  0x63   :  { %1203 = vmatmul.bf16.gmra.mxu3 %v1719_v50  ;;  %1252 = vmatmul.bf16.gmra.mxu0 %v1723_v51  ;;  %v1863_v51 = vor.u32 %v2263_v44, %v1860_v45  ;;  %v1696_v44 = vld [vmem:[%s3188_s0 + $0x84] sm:$0xf0] }
  0x64   :  { %v1702_v45 = vld [vmem:[%s3188_s0 + $0x68] sm:$0xf] }
  0x65   :  { %v1703_v58 = vor.u32 %v2225_v46, %v1702_v45  ;;  %v1766_v45 = vld [vmem:[%s3188_s0 + $0xf0] sm:$0xf]  ;;  %v2242_v46 = vld [vmem:[%s3188_s0 + $0x110] sm:$0xf0] }
  0x71   :  { %1110 = vmatmul.bf16.gmra.mxu1 %v1747_v0  ;;  %1159 = vmatmul.bf16.gmra.mxu2 %v1751_v1  ;;  %v1902_v0 = vld [vmem:[%s3188_s0 + $0x208] sm:$0xf]  ;;  %v2277_v1 = vld [vmem:[%s3188_s0 + $0x228] sm:$0xf0] }
  0x72   :  { %v1903_v8 = vor.u32 %v2277_v1, %v1902_v0 }
  0x73   :  { %1208 = vmatmul.bf16.gmra.mxu3 %v1755_v2  ;;  %1257 = vmatmul.bf16.gmra.mxu0 %v1759_v3 }
  0x81   :  { %1115 = vmatmul.bf16.gmra.mxu1 %v1783_v16  ;;  %1164 = vmatmul.bf16.gmra.mxu2 %v1787_v17  ;;  %v1658_v16 = vld [vmem:[%s3188_s0 + $0x18] sm:$0xf]  ;;  %v2215_v17 = vld [vmem:[%s3188_s0 + $0x38] sm:$0xf0] }
  0x82   :  { %v1659_v25 = vor.u32 %v2215_v17, %v1658_v16  ;;  %v1730_v16 = vld [vmem:[%s3188_s0 + $0xa8] sm:$0xf]  ;;  %v2233_v17 = vld [vmem:[%s3188_s0 + $0xc8] sm:$0xf0] }
  0x83   :  { %1213 = vmatmul.bf16.gmra.mxu3 %v1791_v18  ;;  %1262 = vmatmul.bf16.gmra.mxu0 %v1795_v19  ;;  %v2211_v18 = vld [vmem:[%s3188_s0 + $0x1c] sm:$0xf]  ;;  %v1660_v19 = vld [vmem:[%s3188_s0 + $0x3c] sm:$0xf0] }
  0x84   :  { %v1663_v27 = vor.u32 %v2211_v18, %v1660_v19  ;;  %v1732_v18 = vld [vmem:[%s3188_s0 + $0xcc] sm:$0xf0] }
  0x85   :  { %v1738_v19 = vld [vmem:[%s3188_s0 + $0xb0] sm:$0xf] }
  0x91   :  { %1120 = vmatmul.bf16.gmra.mxu1 %v1819_v32  ;;  %1169 = vmatmul.bf16.gmra.mxu2 %v1823_v33 }
  0x93   :  { %1218 = vmatmul.bf16.gmra.mxu3 %v1827_v34  ;;  %1267 = vmatmul.bf16.gmra.mxu0 %v1831_v35 }
  0x9e   :  { %v2833_v50 = vpop.f32.mrf.mxu1 }
  0xa0   :  { %v1047_v53 = vpop.f32.mrf.mxu0 }
  0xa1   :  { %1125 = vmatmul.bf16.gmra.mxu1 %v1855_v48  ;;  %1174 = vmatmul.bf16.gmra.mxu2 %v1859_v49 }
  0xa3   :  { %1223 = vmatmul.bf16.gmra.mxu3 %v1863_v51  ;;  %1272 = vmatmul.bf16.gmra.mxu0 %v1867_v52  ;;  %v1691_v51 = vor.u32 %v2219_v38, %v1688_v39  ;;  %v1695_v52 = vor.u32 %v2224_v42, %v1694_v41 }
  0xa4   :  { %v2835_v54 = vpop.f32.mrf.mxu2 }
  0xa6   :  { %v2837_v55 = vpop.f32.mrf.mxu3  ;;  %v2839_v56 = vpop.f32.mrf.mxu1 }
  0xa8   :  { %v1049_v57 = vpop.f32.mrf.mxu0 }
  0xac   :  { %v2865_v2 = vpop.f32.mrf.mxu2 }
  0xae   :  { %v2867_v3 = vpop.f32.mrf.mxu3  ;;  %v2869_v6 = vpop.f32.mrf.mxu1 }
  0xb0   :  { %v1052_v9 = vpop.f32.mrf.mxu0 }
  0xb1   :  { %1130 = vmatmul.bf16.gmra.mxu1 %v1891_v4  ;;  %1179 = vmatmul.bf16.gmra.mxu2 %v1895_v5 }
  0xb3   :  { %1228 = vmatmul.bf16.gmra.mxu3 %v1899_v7  ;;  %1277 = vmatmul.bf16.gmra.mxu0 %v1903_v8 }
  0xb4   :  { %v2871_v10 = vpop.f32.mrf.mxu2 }
  0xb6   :  { %v2873_v11 = vpop.f32.mrf.mxu3  ;;  %v2875_v12 = vpop.f32.mrf.mxu1 }
  0xb8   :  { %v1054_v13 = vpop.f32.mrf.mxu0 }
  0xbc   :  { %v2901_v22 = vpop.f32.mrf.mxu2 }
  0xbe   :  { %v2903_v23 = vpop.f32.mrf.mxu3  ;;  %v1096_v26 = vpop.f32.mrf.mxu1 }
  0xbf   :  { %v1097_v29 = vadd.f32 %v1096_v26, %v1047_v53 }
  0xc0   :  { %v1243_v30 = vpop.f32.mrf.mxu0 }
  0xc1   :  { %1291 = vmatmul.bf16.vlgmr.msra.gmra.mxu1 %v1655_v24  ;;  %1340 = vmatmul.bf16.vlgmr.msra.gmra.mxu2 %v1659_v25 }
  0xc3   :  { %1389 = vmatmul.bf16.vlgmr.msra.gmra.mxu3 %v1663_v27  ;;  %1438 = vmatmul.bf16.vlgmr.msra.gmra.mxu0 %v1667_v28  ;;  %v1731_v27 = vor.u32 %v2233_v17, %v1730_v16 }
  0xc4   :  { %v1145_v31 = vpop.f32.mrf.mxu2 }
  0xc5   :  { %v1146_v32 = vadd.f32 %v1145_v31, %v1097_v29 }
  0xc6   :  { %v1194_v33 = vpop.f32.mrf.mxu3  ;;  %v1098_v34 = vpop.f32.mrf.mxu1 }
  0xc7   :  { %v1195_v35 = vadd.f32 %v1194_v33, %v1146_v32  ;;  %v1099_v36 = vadd.f32 %v1098_v34, %v1049_v57  ;;  %v1699_v57 = vor.u32 %v2220_v43, %v1696_v44  ;;  %v2237_v43 = vld [vmem:[%s3188_s0 + $0xec] sm:$0xf] }
  0xc8   :  { %v1245_v37 = vpop.f32.mrf.mxu0 }
  0xc9   :  { %v2911_v40 = vadd.f32 %v1243_v30, %v1195_v35  ;;  %v1739_v30 = vor.u32 %v2234_v20, %v1738_v19  ;;  %v1802_v19 = vld [vmem:[%s3188_s0 + $0x138] sm:$0xf]  ;;  %v2251_v20 = vld [vmem:[%s3188_s0 + $0x158] sm:$0xf0] }
  0xcc   :  { %v1147_v47 = vpop.f32.mrf.mxu2 }
  0xcd   :  { %v1148_v48 = vadd.f32 %v1147_v47, %v1099_v36  ;;  %v1768_v47 = vld [vmem:[%s3188_s0 + $0x114] sm:$0xf0] }
  0xce   :  { %v1196_v49 = vpop.f32.mrf.mxu3  ;;  %v1101_v53 = vpop.f32.mrf.mxu1 }
  0xcf   :  { %v1197_v59 = vadd.f32 %v1196_v49, %v1148_v48  ;;  %v1102_v60 = vadd.f32 %v1101_v53, %v1052_v9  ;;  %v1724_v9 = vld [vmem:[%s3188_s0 + $0xc4] sm:$0xf0]  ;;  %v1774_v48 = vld [vmem:[%s3188_s0 + $0xf8] sm:$0xf]  ;;  %v2243_v49 = vld [vmem:[%s3188_s0 + $0x118] sm:$0xf0] }
  0xd0   :  { %v1248_v61 = vpop.f32.mrf.mxu0  ;;  %v1727_v26 = vor.u32 %v2228_v14, %v1724_v9 }
  0xd1   :  { %1296 = vmatmul.bf16.gmra.mxu1 %v1691_v51  ;;  %1345 = vmatmul.bf16.gmra.mxu2 %v1695_v52  ;;  %v2931_v62 = vadd.f32 %v1245_v37, %v1197_v59 }
  0xd3   :  { %1394 = vmatmul.bf16.gmra.mxu3 %v1699_v57  ;;  %1443 = vmatmul.bf16.gmra.mxu0 %v1703_v58  ;;  %v1767_v58 = vor.u32 %v2242_v46, %v1766_v45  ;;  %v2255_v46 = vld [vmem:[%s3188_s0 + $0x17c] sm:$0xf] }
  0xd4   :  { %v1150_v63 = vpop.f32.mrf.mxu2 }
  0xd5   :  { %v1151_v0 = vadd.f32 %v1150_v63, %v1102_v60 }
  0xd6   :  { %v1199_v1 = vpop.f32.mrf.mxu3  ;;  %v1103_v4 = vpop.f32.mrf.mxu1 }
  0xd7   :  { %v1200_v5 = vadd.f32 %v1199_v1, %v1151_v0  ;;  %v1104_v7 = vadd.f32 %v1103_v4, %v1054_v13  ;;  %v2229_v13 = vld [vmem:[%s3188_s0 + $0xac] sm:$0xf] }
  0xd8   :  { %v1250_v8 = vpop.f32.mrf.mxu0  ;;  %v1735_v29 = vor.u32 %v2229_v13, %v1732_v18  ;;  %v2246_v13 = vld [vmem:[%s3188_s0 + $0x134] sm:$0xf] }
  0xd9   :  { %v2939_v15 = vadd.f32 %v1248_v61, %v1200_v5  ;;  %v1775_v61 = vor.u32 %v2243_v49, %v1774_v48  ;;  %v2260_v48 = vld [vmem:[%s3188_s0 + $0x1a0] sm:$0xf0] }
  0xda   :  { %v2256_v49 = vld [vmem:[%s3188_s0 + $0x184] sm:$0xf] }
  0xdc   :  { %v1152_v21 = vpop.f32.mrf.mxu2 }
  0xdd   :  { %v1153_v24 = vadd.f32 %v1152_v21, %v1104_v7  ;;  %v1804_v21 = vld [vmem:[%s3188_s0 + $0x15c] sm:$0xf0] }
  0xde   :  { %v1201_v25 = vpop.f32.mrf.mxu3  ;;  %v1106_v28 = vpop.f32.mrf.mxu1 }
  0xdf   :  { %v1202_v31 = vadd.f32 %v1201_v25, %v1153_v24  ;;  %v1107_v32 = vadd.f32 %v1106_v28, %v2833_v50  ;;  %v1760_v50 = vld [vmem:[%s3188_s0 + $0x10c] sm:$0xf0]  ;;  %v1810_v24 = vld [vmem:[%s3188_s0 + $0x140] sm:$0xf]  ;;  %v2252_v25 = vld [vmem:[%s3188_s0 + $0x160] sm:$0xf0] }
  0xe0   :  { %v1253_v33 = vpop.f32.mrf.mxu0  ;;  %v1763_v57 = vor.u32 %v2237_v43, %v1760_v50 }
  0xe1   :  { %1301 = vmatmul.bf16.gmra.mxu1 %v1727_v26  ;;  %1350 = vmatmul.bf16.gmra.mxu2 %v1731_v27  ;;  %v2960_v34 = vadd.f32 %v1250_v8, %v1202_v31 }
  0xe3   :  { %1399 = vmatmul.bf16.gmra.mxu3 %v1735_v29  ;;  %1448 = vmatmul.bf16.gmra.mxu0 %v1739_v30  ;;  %v1803_v30 = vor.u32 %v2251_v20, %v1802_v19  ;;  %v2264_v20 = vld [vmem:[%s3188_s0 + $0x1c4] sm:$0xf] }
  0xe4   :  { %v1155_v35 = vpop.f32.mrf.mxu2 }
  0xe5   :  { %v1156_v36 = vadd.f32 %v1155_v35, %v1107_v32 }
  0xe6   :  { %v1204_v37 = vpop.f32.mrf.mxu3  ;;  %v1108_v38 = vpop.f32.mrf.mxu1 }
  0xe7   :  { %v1205_v39 = vadd.f32 %v1204_v37, %v1156_v36  ;;  %v1109_v41 = vadd.f32 %v1108_v38, %v2839_v56  ;;  %v2238_v56 = vld [vmem:[%s3188_s0 + $0xf4] sm:$0xf] }
  0xe8   :  { %v1255_v42 = vpop.f32.mrf.mxu0  ;;  %v1771_v60 = vor.u32 %v2238_v56, %v1768_v47  ;;  %v1832_v56 = vld [vmem:[%s3188_s0 + $0x19c] sm:$0xf0] }
  0xe9   :  { %v2969_v44 = vadd.f32 %v1253_v33, %v1205_v39  ;;  %v1811_v33 = vor.u32 %v2252_v25, %v1810_v24  ;;  %v2269_v24 = vld [vmem:[%s3188_s0 + $0x1e8] sm:$0xf0] }
  0xea   :  { %v2265_v25 = vld [vmem:[%s3188_s0 + $0x1cc] sm:$0xf] }
  0xec   :  { %v1157_v51 = vpop.f32.mrf.mxu2 }
  0xed   :  { %v1158_v52 = vadd.f32 %v1157_v51, %v1109_v41 }
  0xee   :  { %v1206_v53 = vpop.f32.mrf.mxu3  ;;  %v1111_v59 = vpop.f32.mrf.mxu1 }
  0xef   :  { %v1207_v63 = vadd.f32 %v1206_v53, %v1158_v52  ;;  %v1112_v0 = vadd.f32 %v1111_v59, %v2869_v6  ;;  %v1796_v6 = vld [vmem:[%s3188_s0 + $0x154] sm:$0xf0]  ;;  %v1840_v52 = vld [vmem:[%s3188_s0 + $0x1a4] sm:$0xf0] }
  0xf0   :  { %v1258_v1 = vpop.f32.mrf.mxu0  ;;  %v1799_v29 = vor.u32 %v2246_v13, %v1796_v6  ;;  %v1846_v53 = vld [vmem:[%s3188_s0 + $0x188] sm:$0xf] }
  0xf1   :  { %1306 = vmatmul.bf16.gmra.mxu1 %v1763_v57  ;;  %1355 = vmatmul.bf16.gmra.mxu2 %v1767_v58  ;;  %v2990_v4 = vadd.f32 %v1255_v42, %v1207_v63  ;;  %v2261_v57 = vld [vmem:[%s3188_s0 + $0x1a8] sm:$0xf0] }
  0xf3   :  { %1404 = vmatmul.bf16.gmra.mxu3 %v1771_v60  ;;  %1453 = vmatmul.bf16.gmra.mxu0 %v1775_v61  ;;  %v1835_v61 = vor.u32 %v2255_v46, %v1832_v56 }
  0xf4   :  { %v1160_v5 = vpop.f32.mrf.mxu2 }
  0xf5   :  { %v1161_v7 = vadd.f32 %v1160_v5, %v1112_v0 }
  0xf6   :  { %v1209_v8 = vpop.f32.mrf.mxu3  ;;  %v1113_v14 = vpop.f32.mrf.mxu1 }
  0xf7   :  { %v1210_v9 = vadd.f32 %v1209_v8, %v1161_v7  ;;  %v1114_v16 = vadd.f32 %v1113_v14, %v2875_v12  ;;  %v2247_v12 = vld [vmem:[%s3188_s0 + $0x13c] sm:$0xf] }
  0xf8   :  { %v1260_v17 = vpop.f32.mrf.mxu0  ;;  %v1807_v32 = vor.u32 %v2247_v12, %v1804_v21  ;;  %v1868_v12 = vld [vmem:[%s3188_s0 + $0x1e4] sm:$0xf0] }
  0xf9   :  { %v2999_v18 = vadd.f32 %v1258_v1, %v1210_v9  ;;  %v1843_v1 = vor.u32 %v2256_v49, %v1840_v52  ;;  %v2273_v49 = vld [vmem:[%s3188_s0 + $0x20c] sm:$0xf] }
  0xfc   :  { %v1162_v26 = vpop.f32.mrf.mxu2 }
  0xfd   :  { %v1163_v27 = vadd.f32 %v1162_v26, %v1114_v16 }
  0xfe   :  { %v1211_v28 = vpop.f32.mrf.mxu3  ;;  %v1116_v31 = vpop.f32.mrf.mxu1 }
  0xff   :  { %v1212_v35 = vadd.f32 %v1211_v28, %v1163_v27  ;;  %v1117_v38 = vadd.f32 %v1116_v31, %v2835_v54  ;;  %v1838_v54 = vld [vmem:[%s3188_s0 + $0x180] sm:$0xf]  ;;  %v1876_v27 = vld [vmem:[%s3188_s0 + $0x1ec] sm:$0xf0] }
 0x100   :  { %v1263_v36 = vpop.f32.mrf.mxu0  ;;  %v1839_v63 = vor.u32 %v2260_v48, %v1838_v54  ;;  %v1882_v28 = vld [vmem:[%s3188_s0 + $0x1d0] sm:$0xf] }
 0x101   :  { %1311 = vmatmul.bf16.gmra.mxu1 %v1799_v29  ;;  %1360 = vmatmul.bf16.gmra.mxu2 %v1803_v30  ;;  %v3019_v37 = vadd.f32 %v1260_v17, %v1212_v35  ;;  %v2270_v29 = vld [vmem:[%s3188_s0 + $0x1f0] sm:$0xf0] }
 0x103   :  { %1409 = vmatmul.bf16.gmra.mxu3 %v1807_v32  ;;  %1458 = vmatmul.bf16.gmra.mxu0 %v1811_v33  ;;  %v1871_v33 = vor.u32 %v2264_v20, %v1868_v12 }
 0x104   :  { %v1165_v39 = vpop.f32.mrf.mxu2 }
 0x105   :  { %v1166_v41 = vadd.f32 %v1165_v39, %v1117_v38  ;;  %v1879_v38 = vor.u32 %v2265_v25, %v1876_v27 }
 0x106   :  { %v1214_v42 = vpop.f32.mrf.mxu3  ;;  %v1118_v43 = vpop.f32.mrf.mxu1 }
 0x107   :  { %v1215_v50 = vadd.f32 %v1214_v42, %v1166_v41  ;;  %v1119_v51 = vadd.f32 %v1118_v43, %v2865_v2  ;;  %v1847_v2 = vor.u32 %v2261_v57, %v1846_v53  ;;  %v2278_v53 = vld [vmem:[%s3188_s0 + $0x230] sm:$0xf0] }
 0x108   :  { %v1265_v45 = vpop.f32.mrf.mxu0  ;;  %v2274_v57 = vld [vmem:[%s3188_s0 + $0x214] sm:$0xf] }
 0x109   :  { %v3028_v47 = vadd.f32 %v1263_v36, %v1215_v50 }
 0x10c   :  { %v1167_v58 = vpop.f32.mrf.mxu2 }
 0x10d   :  { %v1168_v59 = vadd.f32 %v1167_v58, %v1119_v51  ;;  %v1904_v51 = vld [vmem:[%s3188_s0 + $0x22c] sm:$0xf0] }
 0x10e   :  { %v1216_v60 = vpop.f32.mrf.mxu3  ;;  %v1121_v0 = vpop.f32.mrf.mxu1 }
 0x10f   :  { %v1217_v5 = vadd.f32 %v1216_v60, %v1168_v59  ;;  %v1122_v14 = vadd.f32 %v1121_v0, %v2871_v10  ;;  %v1874_v10 = vld [vmem:[%s3188_s0 + $0x1c8] sm:$0xf]  ;;  %v1912_v59 = vld [vmem:[%s3188_s0 + $0x234] sm:$0xf0] }
 0x110   :  { %v1268_v7 = vpop.f32.mrf.mxu0  ;;  %v1875_v35 = vor.u32 %v2269_v24, %v1874_v10  ;;  %v1918_v60 = vld [vmem:[%s3188_s0 + $0x218] sm:$0xf] }
 0x111   :  { %1316 = vmatmul.bf16.gmra.mxu1 %v1835_v61  ;;  %1365 = vmatmul.bf16.gmra.mxu2 %v1839_v63  ;;  %v3049_v8 = vadd.f32 %v1265_v45, %v1217_v5  ;;  %v2279_v61 = vld [vmem:[%s3188_s0 + $0x238] sm:$0xf0] }
 0x113   :  { %1414 = vmatmul.bf16.gmra.mxu3 %v1843_v1  ;;  %1463 = vmatmul.bf16.gmra.mxu0 %v1847_v2  ;;  %v1907_v2 = vor.u32 %v2273_v49, %v1904_v51 }
 0x114   :  { %v1170_v9 = vpop.f32.mrf.mxu2 }
 0x115   :  { %v1171_v16 = vadd.f32 %v1170_v9, %v1122_v14  ;;  %v1915_v14 = vor.u32 %v2274_v57, %v1912_v59 }
 0x116   :  { %v1219_v17 = vpop.f32.mrf.mxu3  ;;  %v1123_v13 = vpop.f32.mrf.mxu1 }
 0x117   :  { %v1220_v6 = vadd.f32 %v1219_v17, %v1171_v16  ;;  %v1124_v26 = vadd.f32 %v1123_v13, %v2901_v22  ;;  %v1883_v22 = vor.u32 %v2270_v29, %v1882_v28 }
 0x118   :  { %v1270_v19 = vpop.f32.mrf.mxu0 }
 0x119   :  { %v3058_v21 = vadd.f32 %v1268_v7, %v1220_v6 }
 0x11c   :  { %v1172_v30 = vpop.f32.mrf.mxu2 }
 0x11d   :  { %v1173_v31 = vadd.f32 %v1172_v30, %v1124_v26 }
 0x11e   :  { %v1221_v32 = vpop.f32.mrf.mxu3  ;;  %v1126_v36 = vpop.f32.mrf.mxu1 }
 0x11f   :  { %v1222_v39 = vadd.f32 %v1221_v32, %v1173_v31  ;;  %v1127_v43 = vadd.f32 %v1126_v36, %v2837_v55  ;;  %v1910_v55 = vld [vmem:[%s3188_s0 + $0x210] sm:$0xf] }
 0x120   :  { %v1273_v41 = vpop.f32.mrf.mxu0  ;;  %v1911_v5 = vor.u32 %v2278_v53, %v1910_v55 }
 0x121   :  { %1321 = vmatmul.bf16.gmra.mxu1 %v1871_v33  ;;  %1370 = vmatmul.bf16.gmra.mxu2 %v1875_v35  ;;  %v3079_v42 = vadd.f32 %v1270_v19, %v1222_v39 }
 0x123   :  { %1419 = vmatmul.bf16.gmra.mxu3 %v1879_v38  ;;  %1468 = vmatmul.bf16.gmra.mxu0 %v1883_v22 }
 0x124   :  { %v1175_v50 = vpop.f32.mrf.mxu2 }
 0x125   :  { %v1176_v45 = vadd.f32 %v1175_v50, %v1127_v43 }
 0x126   :  { %v1224_v46 = vpop.f32.mrf.mxu3  ;;  %v1128_v56 = vpop.f32.mrf.mxu1 }
 0x127   :  { %v1225_v54 = vadd.f32 %v1224_v46, %v1176_v45  ;;  %v1129_v58 = vadd.f32 %v1128_v56, %v2867_v3  ;;  %v1919_v3 = vor.u32 %v2279_v61, %v1918_v60 }
 0x128   :  { %v1275_v48 = vpop.f32.mrf.mxu0 }
 0x129   :  { %v3088_v52 = vadd.f32 %v1273_v41, %v1225_v54 }
 0x12c   :  { %v1177_v63 = vpop.f32.mrf.mxu2 }
 0x12d   :  { %v1178_v0 = vadd.f32 %v1177_v63, %v1129_v58 }
 0x12e   :  { %v1226_v1 = vpop.f32.mrf.mxu3  ;;  %v1131_v7 = vpop.f32.mrf.mxu1 }
 0x12f   :  { %v1227_v9 = vadd.f32 %v1226_v1, %v1178_v0  ;;  %v1132_v13 = vadd.f32 %v1131_v7, %v2873_v11 }
 0x130   :  { %v1278_v16 = vpop.f32.mrf.mxu0 }
 0x131   :  { %1326 = vmatmul.bf16.gmra.mxu1 %v1907_v2  ;;  %1375 = vmatmul.bf16.gmra.mxu2 %v1911_v5  ;;  %v3109_v17 = vadd.f32 %v1275_v48, %v1227_v9 }
 0x133   :  { %1424 = vmatmul.bf16.gmra.mxu3 %v1915_v14  ;;  %1473 = vmatmul.bf16.gmra.mxu0 %v1919_v3 }
 0x134   :  { %v1180_v6 = vpop.f32.mrf.mxu2 }
 0x135   :  { %v1181_v19 = vadd.f32 %v1180_v6, %v1132_v13 }
 0x136   :  { %v1229_v20 = vpop.f32.mrf.mxu3  ;;  %v1133_v12 = vpop.f32.mrf.mxu1 }
 0x137   :  { %v1230_v10 = vadd.f32 %v1229_v20, %v1181_v19  ;;  %v1134_v26 = vadd.f32 %v1133_v12, %v2903_v23 }
 0x138   :  { %v1280_v24 = vpop.f32.mrf.mxu0 }
 0x139   :  { %v3112_v25 = vadd.f32 %v1278_v16, %v1230_v10 }
 0x13c   :  { %v1182_v27 = vpop.f32.mrf.mxu2 }
 0x13d   :  { %v1183_v28 = vadd.f32 %v1182_v27, %v1134_v26 }
 0x13e   :  { %v1231_v29 = vpop.f32.mrf.mxu3  ;;  %v1292_v30 = vpop.f32.mrf.mxu1 }
 0x13f   :  { %v1232_v31 = vadd.f32 %v1231_v29, %v1183_v28  ;;  %v1293_v11 = vadd.f32 %v1292_v30, %v2911_v40 }
 0x140   :  { %v1439_v32 = vpop.f32.mrf.mxu0 }
 0x141   :  { %v3115_v33 = vadd.f32 %v1280_v24, %v1232_v31 }
 0x144   :  { %v1341_v35 = vpop.f32.mrf.mxu2 }
 0x145   :  { %v1342_v36 = vadd.f32 %v1341_v35, %v1293_v11 }
 0x146   :  { %v1390_v38 = vpop.f32.mrf.mxu3  ;;  %v1294_v22 = vpop.f32.mrf.mxu1 }
 0x147   :  { %v1391_v39 = vadd.f32 %v1390_v38, %v1342_v36  ;;  %v1295_v23 = vadd.f32 %v1294_v22, %v2931_v62 }
 0x148   :  { %v1441_v41 = vpop.f32.mrf.mxu0 }
 0x149   :  { %v1440_v43 = vadd.f32 %v1439_v32, %v1391_v39 }
 0x14b   :  { %1483 = vst [vmem:[%s3189_s2] sm:$0xff] %v1440_v43  ;;  %v1556_v49 = vmul.f32 %v1440_v43, %v1440_v43 }
 0x14c   :  { %v1343_v50 = vpop.f32.mrf.mxu2 }
 0x14d   :  { %v1344_v45 = vadd.f32 %v1343_v50, %v1295_v23 }
 0x14e   :  { %v1392_v46 = vpop.f32.mrf.mxu3  ;;  %v1297_v56 = vpop.f32.mrf.mxu1 }
 0x14f   :  { %v1393_v54 = vadd.f32 %v1392_v46, %v1344_v45  ;;  %v1298_v53 = vadd.f32 %v1297_v56, %v2939_v15 }
 0x150   :  { %v1444_v48 = vpop.f32.mrf.mxu0 }
 0x151   :  { %v1442_v40 = vadd.f32 %v1441_v41, %v1393_v54 }
 0x153   :  { %1484 = vst [vmem:[%s3189_s2 + $0x8] sm:$0xff] %v1442_v40  ;;  %v1559_v51 = vadd.f32 %v1442_v40, %v1440_v43  ;;  %v1560_v55 = vmul.f32 %v1442_v40, %v1442_v40 }
 0x154   :  { %v1346_v57 = vpop.f32.mrf.mxu2 }
 0x155   :  { %v1561_v58 = vadd.f32 %v1560_v55, %v1556_v49  ;;  %v1347_v59 = vadd.f32 %v1346_v57, %v1298_v53 }
 0x156   :  { %v1395_v62 = vpop.f32.mrf.mxu3  ;;  %v1299_v60 = vpop.f32.mrf.mxu1 }
 0x157   :  { %v1396_v61 = vadd.f32 %v1395_v62, %v1347_v59  ;;  %v1300_v5 = vadd.f32 %v1299_v60, %v2960_v34 }
 0x158   :  { %v1446_v63 = vpop.f32.mrf.mxu0 }
 0x159   :  { %v1445_v0 = vadd.f32 %v1444_v48, %v1396_v61 }
 0x15b   :  { %1485 = vst [vmem:[%s3189_s2 + $0x10] sm:$0xff] %v1445_v0  ;;  %v1563_v1 = vadd.f32 %v1559_v51, %v1445_v0  ;;  %v1564_v2 = vmul.f32 %v1445_v0, %v1445_v0 }
 0x15c   :  { %v1348_v7 = vpop.f32.mrf.mxu2 }
 0x15d   :  { %v1565_v14 = vadd.f32 %v1564_v2, %v1561_v58  ;;  %v1349_v3 = vadd.f32 %v1348_v7, %v1300_v5 }
 0x15e   :  { %v1397_v15 = vpop.f32.mrf.mxu3  ;;  %v1302_v9 = vpop.f32.mrf.mxu1 }
 0x15f   :  { %v1398_v16 = vadd.f32 %v1397_v15, %v1349_v3  ;;  %v1303_v12 = vadd.f32 %v1302_v9, %v2969_v44 }
 0x160   :  { %v1449_v13 = vpop.f32.mrf.mxu0 }
 0x161   :  { %v1447_v6 = vadd.f32 %v1446_v63, %v1398_v16 }
 0x163   :  { %1486 = vst [vmem:[%s3189_s2 + $0x18] sm:$0xff] %v1447_v6  ;;  %v1567_v19 = vadd.f32 %v1563_v1, %v1447_v6  ;;  %v1568_v20 = vmul.f32 %v1447_v6, %v1447_v6 }
 0x164   :  { %v1351_v10 = vpop.f32.mrf.mxu2 }
 0x165   :  { %v1569_v24 = vadd.f32 %v1568_v20, %v1565_v14  ;;  %v1352_v26 = vadd.f32 %v1351_v10, %v1303_v12 }
 0x166   :  { %v1400_v34 = vpop.f32.mrf.mxu3  ;;  %v1304_v27 = vpop.f32.mrf.mxu1 }
 0x167   :  { %v1401_v28 = vadd.f32 %v1400_v34, %v1352_v26  ;;  %v1305_v11 = vadd.f32 %v1304_v27, %v2990_v4 }
 0x168   :  { %v1451_v29 = vpop.f32.mrf.mxu0 }
 0x169   :  { %v1450_v30 = vadd.f32 %v1449_v13, %v1401_v28 }
 0x16b   :  { %1487 = vst [vmem:[%s3189_s2 + $0x20] sm:$0xff] %v1450_v30  ;;  %v1571_v31 = vadd.f32 %v1567_v19, %v1450_v30  ;;  %v1572_v32 = vmul.f32 %v1450_v30, %v1450_v30 }
 0x16c   :  { %v1353_v35 = vpop.f32.mrf.mxu2 }
 0x16d   :  { %v1573_v36 = vadd.f32 %v1572_v32, %v1569_v24  ;;  %v1354_v38 = vadd.f32 %v1353_v35, %v1305_v11 }
 0x16e   :  { %v1402_v44 = vpop.f32.mrf.mxu3  ;;  %v1307_v22 = vpop.f32.mrf.mxu1 }
 0x16f   :  { %v1403_v39 = vadd.f32 %v1402_v44, %v1354_v38  ;;  %v1308_v45 = vadd.f32 %v1307_v22, %v2999_v18 }
 0x170   :  { %v1454_v41 = vpop.f32.mrf.mxu0 }
 0x171   :  { %v1452_v43 = vadd.f32 %v1451_v29, %v1403_v39 }
 0x173   :  { %1488 = vst [vmem:[%s3189_s2 + $0x28] sm:$0xff] %v1452_v43  ;;  %v1575_v23 = vadd.f32 %v1571_v31, %v1452_v43  ;;  %v1576_v50 = vmul.f32 %v1452_v43, %v1452_v43 }
 0x174   :  { %v1356_v46 = vpop.f32.mrf.mxu2 }
 0x175   :  { %v1577_v56 = vadd.f32 %v1576_v50, %v1573_v36  ;;  %v1357_v54 = vadd.f32 %v1356_v46, %v1308_v45 }
 0x176   :  { %v1405_v4 = vpop.f32.mrf.mxu3  ;;  %v1309_v48 = vpop.f32.mrf.mxu1 }
 0x177   :  { %v1406_v40 = vadd.f32 %v1405_v4, %v1357_v54  ;;  %v1310_v57 = vadd.f32 %v1309_v48, %v3019_v37 }
 0x178   :  { %v1456_v49 = vpop.f32.mrf.mxu0 }
 0x179   :  { %v1455_v51 = vadd.f32 %v1454_v41, %v1406_v40 }
 0x17b   :  { %1489 = vst [vmem:[%s3189_s2 + $0x30] sm:$0xff] %v1455_v51  ;;  %v1579_v55 = vadd.f32 %v1575_v23, %v1455_v51  ;;  %v1580_v53 = vmul.f32 %v1455_v51, %v1455_v51 }
 0x17c   :  { %v1358_v58 = vpop.f32.mrf.mxu2 }
 0x17d   :  { %v1581_v59 = vadd.f32 %v1580_v53, %v1577_v56  ;;  %v1359_v62 = vadd.f32 %v1358_v58, %v1310_v57 }
 0x17e   :  { %v1407_v18 = vpop.f32.mrf.mxu3  ;;  %v1312_v60 = vpop.f32.mrf.mxu1 }
 0x17f   :  { %v1408_v61 = vadd.f32 %v1407_v18, %v1359_v62  ;;  %v1313_v5 = vadd.f32 %v1312_v60, %v3028_v47 }
 0x180   :  { %v1459_v63 = vpop.f32.mrf.mxu0 }
 0x181   :  { %v1457_v0 = vadd.f32 %v1456_v49, %v1408_v61 }
 0x183   :  { %1490 = vst [vmem:[%s3189_s2 + $0x38] sm:$0xff] %v1457_v0  ;;  %v1583_v1 = vadd.f32 %v1579_v55, %v1457_v0  ;;  %v1584_v2 = vmul.f32 %v1457_v0, %v1457_v0 }
 0x184   :  { %v1361_v7 = vpop.f32.mrf.mxu2 }
 0x185   :  { %v1585_v14 = vadd.f32 %v1584_v2, %v1581_v59  ;;  %v1362_v3 = vadd.f32 %v1361_v7, %v1313_v5 }
 0x186   :  { %v1410_v37 = vpop.f32.mrf.mxu3  ;;  %v1314_v15 = vpop.f32.mrf.mxu1 }
 0x187   :  { %v1411_v9 = vadd.f32 %v1410_v37, %v1362_v3  ;;  %v1315_v20 = vadd.f32 %v1314_v15, %v3049_v8 }
 0x188   :  { %v1461_v16 = vpop.f32.mrf.mxu0 }
 0x189   :  { %v1460_v13 = vadd.f32 %v1459_v63, %v1411_v9 }
 0x18b   :  { %1491 = vst [vmem:[%s3189_s2 + $0x40] sm:$0xff] %v1460_v13  ;;  %v1587_v6 = vadd.f32 %v1583_v1, %v1460_v13  ;;  %v1588_v19 = vmul.f32 %v1460_v13, %v1460_v13 }
 0x18c   :  { %v1363_v12 = vpop.f32.mrf.mxu2 }
 0x18d   :  { %v1589_v10 = vadd.f32 %v1588_v19, %v1585_v14  ;;  %v1364_v24 = vadd.f32 %v1363_v12, %v1315_v20 }
 0x18e   :  { %v1412_v47 = vpop.f32.mrf.mxu3  ;;  %v1317_v26 = vpop.f32.mrf.mxu1 }
 0x18f   :  { %v1413_v34 = vadd.f32 %v1412_v47, %v1364_v24  ;;  %v1318_v31 = vadd.f32 %v1317_v26, %v3058_v21 }
 0x190   :  { %v1464_v27 = vpop.f32.mrf.mxu0 }
 0x191   :  { %v1462_v28 = vadd.f32 %v1461_v16, %v1413_v34 }
 0x193   :  { %1492 = vst [vmem:[%s3189_s2 + $0x48] sm:$0xff] %v1462_v28  ;;  %v1591_v29 = vadd.f32 %v1587_v6, %v1462_v28  ;;  %v1592_v30 = vmul.f32 %v1462_v28, %v1462_v28 }
 0x194   :  { %v1366_v32 = vpop.f32.mrf.mxu2 }
 0x195   :  { %v1593_v11 = vadd.f32 %v1592_v30, %v1589_v10  ;;  %v1367_v35 = vadd.f32 %v1366_v32, %v1318_v31 }
 0x196   :  { %v1415_v8 = vpop.f32.mrf.mxu3  ;;  %v1319_v36 = vpop.f32.mrf.mxu1 }
 0x197   :  { %v1416_v38 = vadd.f32 %v1415_v8, %v1367_v35  ;;  %v1320_v43 = vadd.f32 %v1319_v36, %v3079_v42 }
 0x198   :  { %v1466_v44 = vpop.f32.mrf.mxu0 }
 0x199   :  { %v1465_v22 = vadd.f32 %v1464_v27, %v1416_v38 }
 0x19b   :  { %1493 = vst [vmem:[%s3189_s2 + $0x50] sm:$0xff] %v1465_v22  ;;  %v1595_v39 = vadd.f32 %v1591_v29, %v1465_v22  ;;  %v1596_v41 = vmul.f32 %v1465_v22, %v1465_v22 }
 0x19c   :  { %v1368_v23 = vpop.f32.mrf.mxu2 }
 0x19d   :  { %v1597_v50 = vadd.f32 %v1596_v41, %v1593_v11  ;;  %v1369_v45 = vadd.f32 %v1368_v23, %v1320_v43 }
 0x19e   :  { %v1417_v21 = vpop.f32.mrf.mxu3  ;;  %v1322_v46 = vpop.f32.mrf.mxu1 }
 0x19f   :  { %v1418_v56 = vadd.f32 %v1417_v21, %v1369_v45  ;;  %v1323_v49 = vadd.f32 %v1322_v46, %v3088_v52 }
 0x1a0   :  { %v1469_v4 = vpop.f32.mrf.mxu0 }
 0x1a1   :  { %v1467_v54 = vadd.f32 %v1466_v44, %v1418_v56 }
 0x1a3   :  { %1494 = vst [vmem:[%s3189_s2 + $0x58] sm:$0xff] %v1467_v54  ;;  %v1599_v48 = vadd.f32 %v1595_v39, %v1467_v54  ;;  %v1600_v40 = vmul.f32 %v1467_v54, %v1467_v54 }
 0x1a4   :  { %v1371_v51 = vpop.f32.mrf.mxu2 }
 0x1a5   :  { %v1601_v55 = vadd.f32 %v1600_v40, %v1597_v50  ;;  %v1372_v53 = vadd.f32 %v1371_v51, %v1323_v49 }
 0x1a6   :  { %v1420_v42 = vpop.f32.mrf.mxu3  ;;  %v1324_v57 = vpop.f32.mrf.mxu1 }
 0x1a7   :  { %v1421_v58 = vadd.f32 %v1420_v42, %v1372_v53  ;;  %v1325_v60 = vadd.f32 %v1324_v57, %v3109_v17 }
 0x1a8   :  { %v1471_v61 = vpop.f32.mrf.mxu0 }
 0x1a9   :  { %v1470_v59 = vadd.f32 %v1469_v4, %v1421_v58 }
 0x1ab   :  { %1495 = vst [vmem:[%s3189_s2 + $0x60] sm:$0xff] %v1470_v59  ;;  %v1603_v62 = vadd.f32 %v1599_v48, %v1470_v59  ;;  %v1604_v18 = vmul.f32 %v1470_v59, %v1470_v59 }
 0x1ac   :  { %v1373_v63 = vpop.f32.mrf.mxu2 }
 0x1ad   :  { %v1605_v0 = vadd.f32 %v1604_v18, %v1601_v55  ;;  %v1374_v1 = vadd.f32 %v1373_v63, %v1325_v60 }
 0x1ae   :  { %v1422_v52 = vpop.f32.mrf.mxu3  ;;  %v1327_v2 = vpop.f32.mrf.mxu1 }
 0x1af   :  { %v1423_v5 = vadd.f32 %v1422_v52, %v1374_v1  ;;  %v1328_v37 = vadd.f32 %v1327_v2, %v3112_v25 }
 0x1b0   :  { %v1474_v13 = vpop.f32.mrf.mxu0 }
 0x1b1   :  { %v1472_v7 = vadd.f32 %v1471_v61, %v1423_v5 }
 0x1b3   :  { %1496 = vst [vmem:[%s3189_s2 + $0x68] sm:$0xff] %v1472_v7  ;;  %v1607_v14 = vadd.f32 %v1603_v62, %v1472_v7  ;;  %v1608_v3 = vmul.f32 %v1472_v7, %v1472_v7 }
 0x1b4   :  { %v1376_v15 = vpop.f32.mrf.mxu2 }
 0x1b5   :  { %v1609_v9 = vadd.f32 %v1608_v3, %v1605_v0  ;;  %v1377_v16 = vadd.f32 %v1376_v15, %v1328_v37 }
 0x1b6   :  { %v1425_v17 = vpop.f32.mrf.mxu3  ;;  %v1329_v19 = vpop.f32.mrf.mxu1 }
 0x1b7   :  { %v1426_v6 = vadd.f32 %v1425_v17, %v1377_v16  ;;  %v1330_v24 = vadd.f32 %v1329_v19, %v3115_v33 }
 0x1b8   :  { %v1476_v28 = vpop.f32.mrf.mxu0 }
 0x1b9   :  { %v1475_v20 = vadd.f32 %v1474_v13, %v1426_v6 }
 0x1bb   :  { %1497 = vst [vmem:[%s3189_s2 + $0x70] sm:$0xff] %v1475_v20  ;;  %v1611_v12 = vadd.f32 %v1607_v14, %v1475_v20  ;;  %v1612_v10 = vmul.f32 %v1475_v20, %v1475_v20 }
 0x1bc   :  { %v1378_v47 = vpop.f32.mrf.mxu2 }
 0x1bd   :  { %v1613_v26 = vadd.f32 %v1612_v10, %v1609_v9  ;;  %v1379_v34 = vadd.f32 %v1378_v47, %v1330_v24 }
 0x1be   :  { %v1427_v25 = vpop.f32.mrf.mxu3 }
 0x1bf   :  { %v1428_v27 = vadd.f32 %v1427_v25, %v1379_v34 }
 0x1c1   :  { %v1477_v29 = vadd.f32 %v1476_v28, %v1428_v27 }
 0x1c3   :  { %1498 = vst [vmem:[%s3189_s2 + $0x78] sm:$0xff] %v1477_v29  ;;  %v1615_v30 = vadd.f32 %v1611_v12, %v1477_v29  ;;  %v1616_v31 = vmul.f32 %v1477_v29, %v1477_v29 }
 0x1c5   :  { %v1617_v32 = vadd.f32 %v1616_v31, %v1613_v26  ;;  %1618 = vst [vmem:[%s3190_s3] sm:$0xff] %v1615_v30 }
 0x1c7   :  { %1619 = vst [vmem:[%s3191_s4] sm:$0xff] %v1617_v32 }

</bundles_post_ra>
